<compile_context>
chip_gen: v7x
topology: tpu7x:2x2x1
jax: 0.10.0
libtpu: 0.0.40
codegen_flags: <defaults>
</compile_context>

<pallas_src>
import numpy as np

import jax
import jax.numpy as jnp
from jax.experimental import pallas as pl
from jax.experimental.pallas import tpu as pltpu

NEG_SLOPE = 0.01   # torch.nn.LeakyReLU default negative_slope
BN_EPS = 1e-5      # torch.nn.BatchNorm2d default eps

CP = 128           # output-channel lane width (conv outputs padded to 128 lanes)
BP = 8             # padded batch rows for the pooled / fc output
RP = 16            # bf16 sublane tile; every row count / K padding is a multiple


def _round_up(x, m):
    return ((x + m - 1) // m) * m


def _conv_hw(h, w, k, s, p):
    return (h + 2 * p - k) // s + 1, (w + 2 * p - k) // s + 1


def _fill_gather(blob, row0, batch, h, w, k, stride, pad, mo):
    """Stacked 0/1 per-tap row-gather matrices written into blob[row0:...]."""
    oh, ow = _conv_hw(h, w, k, stride, pad)
    for b in range(batch):
        for oy in range(oh):
            for ox in range(ow):
                r = b * oh * ow + oy * ow + ox
                for kh in range(k):
                    for kw in range(k):
                        ih = oy * stride + kh - pad
                        iw = ox * stride + kw - pad
                        if 0 <= ih < h and 0 <= iw < w:
                            blob[row0 + (kh * k + kw) * mo + r,
                                 b * h * w + ih * w + iw] = 1.0


def _torch_conv_init(key, cout, cin, k, bias=True):
    """torch.nn.Conv2d default init (uniform +-1/sqrt(fan_in))."""
    fan_in = cin * k * k
    bound = float(fan_in ** -0.5)
    kw_, kb_ = jax.random.split(key)
    wt = jax.random.uniform(kw_, (cout, cin, k, k), jnp.float32, -bound, bound)
    bs = (jax.random.uniform(kb_, (cout,), jnp.float32, -bound, bound)
          if bias else jnp.zeros((cout,), jnp.float32))
    return np.asarray(wt), np.asarray(bs)


def _fill_conv_taps(blob, row0, wt, kp):
    """Per-tap (kp, CP) weight matrices, rows = input channels, stacked at row0."""
    cout, cin, k, _ = wt.shape
    taps = np.transpose(wt, (2, 3, 1, 0)).reshape(k * k, cin, cout)
    for t in range(k * k):
        blob[row0 + t * kp: row0 + t * kp + cin, :cout] = taps[t]


def build_custom_cnn(key, input_shape, num_actions, batch_size):
    """Returns (forward_fn, params) specialised to (batch, C, H, W)."""
    c, h, w = input_shape
    b = batch_size
    assert b <= BP and num_actions <= CP
    assert h % 4 == 0 and w % 4 == 0, "wrapper im2col assumes stride-4 aligned HxW"

    # layer output spatial sizes
    h1, w1 = _conv_hw(h, w, 4, 4, 2)        # basic : C  -> 24
    h2, w2 = _conv_hw(h1, w1, 3, 2, 1)      # res1  : 24 -> 48 (first block, s=2)
    h3, w3 = _conv_hw(h2, w2, 3, 2, 1)      # res2  : 48 -> 96 (first block, s=2)

    # padded activation row counts (rows = (batch, y, x) row-major)
    m1 = _round_up(b * h1 * w1, RP)
    m2 = _round_up(b * h2 * w2, RP)
    m3 = _round_up(b * h3 * w3, RP)
    gl = max(m1, m2, m3)                    # gather-blob lane width

    # trimmed matmul K widths (input channels / im2col patch width, 16-aligned)
    k1 = _round_up(4 * 4 * c, RP)           # conv1 patch columns
    kc24 = _round_up(24, RP)                # 24 -> 32
    kc48 = _round_up(48, RP)
    kc96 = _round_up(96, RP)

    # ---- packed "front" weight blob (basic + res1): auto-DMA'd into VMEM ----
    o_w1 = 0
    o_w2 = o_w1 + k1
    o_w3 = o_w2 + 9 * kc24
    o_wa1 = o_w3 + 9 * kc48
    front_rows = o_wa1 + kc24

    # ---- packed "back" weight blob (res2 + fc): manual, overlapped DMA ----
    o_w4 = 0
    o_w5 = o_w4 + 9 * kc48
    o_wa2 = o_w5 + 9 * kc96
    o_wf = o_wa2 + kc48
    back_rows = o_wf + kc96

    # ---- packed gather / pool blob ----
    o_g2 = 0
    o_g3 = o_g2 + 9 * m2
    o_ga1 = o_g3 + 9 * m2
    o_g4 = o_ga1 + m2
    o_g5 = o_g4 + 9 * m3
    o_ga2 = o_g5 + 9 * m3
    o_pool = o_ga2 + m3
    g_rows = _round_up(o_pool + BP, RP)

    wfront = np.zeros((front_rows, CP), np.float32)
    wback = np.zeros((back_rows, CP), np.float32)
    bias = np.zeros((BP, CP), np.float32)
    gblob = np.zeros((g_rows, gl), np.float32)

    ks = jax.random.split(key, 8)

    # basic: Conv(C -> 24, k=4, s=4, p=2); repacked for wrapper-side im2col
    wt1, bs1 = _torch_conv_init(ks[0], 24, c, 4)
    wfront[o_w1:o_w1 + 4 * 4 * c, :24] = (
        np.transpose(wt1, (2, 3, 1, 0)).reshape(4 * 4 * c, 24))
    bias[0, :24] = bs1

    # res1: Basic(24->48, s=2), Basic(48->48, s=1), 1x1 s=2 projection + BN
    wt2, bs2 = _torch_conv_init(ks[1], 48, 24, 3)
    _fill_conv_taps(wfront, o_w2, wt2, kc24)
    bias[1, :48] = bs2
    wt3, bs3 = _torch_conv_init(ks[2], 48, 48, 3)
    _fill_conv_taps(wfront, o_w3, wt3, kc48)
    bias[2, :48] = bs3
    wa1, _ = _torch_conv_init(ks[3], 48, 24, 1, bias=False)
    # TODO(synk): BatchNorm2d folded with fresh inference stats (mean=0, var=1,
    # gamma=1, beta=0); trained running stats / training-mode batch statistics
    # are not modelled.
    bn_scale = 1.0 / float(np.sqrt(1.0 + BN_EPS))
    wfront[o_wa1:o_wa1 + 24, :48] = wa1[:, :, 0, 0].T * bn_scale

    # res2: Basic(48->96, s=2), Basic(96->96, s=1), 1x1 s=2 projection + BN
    wt4, bs4 = _torch_conv_init(ks[4], 96, 48, 3)
    _fill_conv_taps(wback, o_w4, wt4, kc48)
    bias[3, :96] = bs4
    wt5, bs5 = _torch_conv_init(ks[5], 96, 96, 3)
    _fill_conv_taps(wback, o_w5, wt5, kc96)
    bias[4, :96] = bs5
    wa2, _ = _torch_conv_init(ks[6], 96, 48, 1, bias=False)
    wback[o_wa2:o_wa2 + 48, :96] = wa2[:, :, 0, 0].T * bn_scale

    # fc: Linear(96 -> num_actions)
    kfw, kfb = jax.random.split(ks[7])
    fbound = float(96 ** -0.5)
    fc_w = np.asarray(jax.random.uniform(kfw, (num_actions, 96), jnp.float32,
                                         -fbound, fbound))
    fc_b = np.asarray(jax.random.uniform(kfb, (num_actions,), jnp.float32,
                                         -fbound, fbound))
    wback[o_wf:o_wf + 96, :num_actions] = fc_w.T
    bias[5, :num_actions] = fc_b

    # gather / pool matrices (0/1 row gathers encode padding + stride; the
    # 1/(h3*w3) of the global average pool is folded into the pool matrix)
    _fill_gather(gblob, o_g2, b, h1, w1, 3, 2, 1, m2)
    _fill_gather(gblob, o_g3, b, h2, w2, 3, 1, 1, m2)
    _fill_gather(gblob, o_ga1, b, h1, w1, 1, 2, 0, m2)
    _fill_gather(gblob, o_g4, b, h2, w2, 3, 2, 1, m3)
    _fill_gather(gblob, o_g5, b, h3, w3, 3, 1, 1, m3)
    _fill_gather(gblob, o_ga2, b, h2, w2, 1, 2, 0, m3)
    inv_hw = 1.0 / float(h3 * w3)
    for bb in range(b):
        gblob[o_pool + bb, bb * h3 * w3:(bb + 1) * h3 * w3] = inv_hw

    params = {
        "wfront": jnp.asarray(wfront, jnp.bfloat16),
        "wback": jnp.asarray(wback, jnp.bfloat16),
        "gather": jnp.asarray(gblob, jnp.bfloat16),
        "bias": jnp.asarray(bias, jnp.float32),
    }

    f32, bf16 = jnp.float32, jnp.bfloat16

    # ------------------------------ fused kernel ------------------------------
    def kernel(a0_ref, wfront_ref, gather_ref, bias_ref, wback_hbm, out_ref,
               wback_vmem, dma_sem):
        # Start the res2/fc weight DMA immediately; basic+res1 compute hides it.
        back_cp = pltpu.make_async_copy(wback_hbm, wback_vmem, dma_sem)
        back_cp.start()

        def leaky(v):
            return jnp.where(v >= 0, v, NEG_SLOPE * v)

        def conv3x3(a_bf, w_ref, w_off, kp, g_off, m_in, mo, bias_row):
            """3x3 conv: one gather matmul + 9 per-tap weight matmuls, f32 acc."""
            a_k = a_bf[:, :kp]                                     # (m_in, kp)
            g = gather_ref[g_off:g_off + 9 * mo, :m_in]            # (9*mo, m_in)
            gathered = jnp.dot(g, a_k, preferred_element_type=f32).astype(bf16)
            acc = None
            for t in range(9):
                w_t = w_ref[w_off + t * kp:w_off + (t + 1) * kp, :]
                part = jnp.dot(gathered[t * mo:(t + 1) * mo, :], w_t,
                               preferred_element_type=f32)
                acc = part if acc is None else acc + part
            # TODO(synk): on v7x the per-tap sum could accumulate in the MXU MRB
            # (pltpu.matmul_acc_lhs); kept as portable dot+add for v5e/v6e.
            return acc + bias_ref[bias_row:bias_row + 1, :]

        def project(a_bf, w_ref, w_off, kp, g_off, m_in, mo):
            """1x1 strided projection (bias-free; BN scale folded into weights)."""
            a_k = a_bf[:, :kp]
            g = gather_ref[g_off:g_off + mo, :m_in]
            gathered = jnp.dot(g, a_k, preferred_element_type=f32).astype(bf16)
            return jnp.dot(gathered, w_ref[w_off:w_off + kp, :],
                           preferred_element_type=f32)

        # basic: Conv(C->24, k=4, s=4, p=2) + LeakyReLU; im2col was done in the
        # wrapper so this is a single matmul.
        a1 = leaky(jnp.dot(a0_ref[...], wfront_ref[o_w1:o_w1 + k1, :],
                           preferred_element_type=f32)
                   + bias_ref[0:1, :]).astype(bf16)                 # (m1, 128)

        # res1: leaky( leaky(conv3(leaky(conv2(a1)))) + BN(1x1 proj(a1)) )
        y = leaky(conv3x3(a1, wfront_ref, o_w2, kc24, o_g2, m1, m2, 1)).astype(bf16)
        y = leaky(conv3x3(y, wfront_ref, o_w3, kc48, o_g3, m2, m2, 2))
        a2 = leaky(y + project(a1, wfront_ref, o_wa1, kc24,
                               o_ga1, m1, m2)).astype(bf16)

        # res2 / fc weights are needed from here on: wait for the overlapped DMA.
        back_cp.wait()

        y = leaky(conv3x3(a2, wback_vmem, o_w4, kc48, o_g4, m2, m3, 3)).astype(bf16)
        y = leaky(conv3x3(y, wback_vmem, o_w5, kc96, o_g5, m3, m3, 4))
        a3 = leaky(y + project(a2, wback_vmem, o_wa2, kc48,
                               o_ga2, m2, m3)).astype(bf16)

        # global average pool (1/(h3*w3) folded into pool matrix) + fc
        pooled = jnp.dot(gather_ref[o_pool:o_pool + BP, :m3], a3,
                         preferred_element_type=f32)                # (BP, 128)
        out_ref[...] = (jnp.dot(pooled[:, :kc96].astype(bf16),
                                wback_vmem[o_wf:o_wf + kc96, :],
                                preferred_element_type=f32)
                        + bias_ref[5:6, :])

    # advisory cost hint for XLA scheduling around this micro-kernel
    def _mm(m, k, n):
        return 2 * m * k * n

    flops = (_mm(m1, k1, CP)
             + _mm(9 * m2, m1, kc24) + 9 * _mm(m2, kc24, CP)
             + _mm(9 * m2, m2, kc48) + 9 * _mm(m2, kc48, CP)
             + _mm(m2, m1, kc24) + _mm(m2, kc24, CP)
             + _mm(9 * m3, m2, kc48) + 9 * _mm(m3, kc48, CP)
             + _mm(9 * m3, m3, kc96) + 9 * _mm(m3, kc96, CP)
             + _mm(m3, m2, kc48) + _mm(m3, kc48, CP)
             + _mm(BP, m3, CP) + _mm(BP, kc96, CP))
    bytes_accessed = (m1 * k1 * 2 + front_rows * CP * 2 + back_rows * CP * 2
                      + g_rows * gl * 2 + BP * CP * 4 + BP * CP * 4)

    fused_call = pl.pallas_call(
        kernel,
        out_shape=jax.ShapeDtypeStruct((BP, CP), jnp.float32),
        in_specs=[
            pl.BlockSpec(memory_space=pltpu.MemorySpace.VMEM),   # a0 (im2col input)
            pl.BlockSpec(memory_space=pltpu.MemorySpace.VMEM),   # front weights
            pl.BlockSpec(memory_space=pltpu.MemorySpace.VMEM),   # gather/pool blob
            pl.BlockSpec(memory_space=pltpu.MemorySpace.VMEM),   # biases
            pl.BlockSpec(memory_space=pl.ANY),                   # back weights (HBM)
        ],
        out_specs=pl.BlockSpec(memory_space=pltpu.MemorySpace.VMEM),
        scratch_shapes=[
            pltpu.VMEM((back_rows, CP), jnp.bfloat16),           # back-weight buffer
            pltpu.SemaphoreType.DMA(()),
        ],
        cost_estimate=pl.CostEstimate(flops=flops, transcendentals=0,
                                      bytes_accessed=bytes_accessed),
    )

    @jax.jit
    def forward(x_nchw, p):
        if x_nchw.shape != (b, c, h, w):
            raise ValueError(
                f"params specialised to input shape {(b, c, h, w)}, "
                f"got {x_nchw.shape}")
        # layer-1 im2col in the wrapper: zero-pad by 2, then non-overlapping 4x4
        # patches (kernel == stride), columns ordered (kh, kw, cin).
        xp = jnp.pad(x_nchw.astype(jnp.float32), ((0, 0), (0, 0), (2, 2), (2, 2)))
        xp = xp.reshape(b, c, h1, 4, w1, 4)
        xp = jnp.transpose(xp, (0, 2, 4, 3, 5, 1))       # (b, oy, ox, kh, kw, cin)
        a0 = xp.reshape(b * h1 * w1, 4 * 4 * c)
        a0 = jnp.pad(a0, ((0, m1 - b * h1 * w1), (0, k1 - 4 * 4 * c)))
        out = fused_call(a0.astype(jnp.bfloat16), p["wfront"], p["gather"],
                         p["bias"], p["wback"])
        return out[:b, :num_actions]

    return forward, params


if __name__ == "__main__":
    key = jax.random.PRNGKey(0)
    k_par, k_in = jax.random.split(key)

    B, C, H, W = 2, 4, 16, 16               # input_shape=(4, 16, 16), batch=2
    NUM_ACTIONS = 6

    forward, params = build_custom_cnn(k_par, (C, H, W), NUM_ACTIONS, batch_size=B)
    x = jax.random.normal(k_in, (B, C, H, W), jnp.float32)

    out = jax.block_until_ready(forward(x, params))
    assert out.shape == (B, NUM_ACTIONS), out.shape
    assert bool(jnp.all(jnp.isfinite(out)))
    print("KERNEL_OK")
</pallas_src>

<mosaic_0001>
module attributes {stable_mosaic.version = 11 : i64} {
  func.func @kernel(%arg0: memref<64x64xbf16, #tpu.memory_space<vmem>>, %arg1: memref<816x128xbf16, #tpu.memory_space<vmem>>, %arg2: memref<928x64xbf16, #tpu.memory_space<vmem>>, %arg3: memref<8x128xf32, #tpu.memory_space<vmem>>, %arg4: memref<1440x128xbf16, #tpu.memory_space<any>>, %arg5: memref<8x128xf32, #tpu.memory_space<vmem>>, %arg6: memref<1440x128xbf16, #tpu.memory_space<vmem>>, %arg7: memref<!tpu.dma_semaphore, #tpu.memory_space<semaphore_mem>>) attributes {dimension_semantics = [], scalar_prefetch = 0 : i64, scratch_operands = 2 : i64, tpu.core_type = #tpu.core_type<tc>} {
    tpu.enqueue_dma source(%arg4 : memref<1440x128xbf16, #tpu.memory_space<any>>) target(%arg6 : memref<1440x128xbf16, #tpu.memory_space<vmem>>) target_semaphore(%arg7 : memref<!tpu.dma_semaphore, #tpu.memory_space<semaphore_mem>>)
    %c0 = arith.constant 0 : index
    %c0_0 = arith.constant 0 : index
    %0 = vector.load %arg0[%c0, %c0_0] : memref<64x64xbf16, #tpu.memory_space<vmem>>, vector<64x64xbf16>
    %c0_1 = arith.constant 0 : index
    %c0_2 = arith.constant 0 : index
    %1 = vector.load %arg1[%c0_1, %c0_2] : memref<816x128xbf16, #tpu.memory_space<vmem>>, vector<64x128xbf16>
    %cst = arith.constant dense<0.000000e+00> : vector<64x128xf32>
    %2 = tpu.matmul %0, %1, %cst {dimension_numbers = #tpu.dot_dimension_numbers<[1], [0], [0], [1], [0, 0, 1, 1], [], []>} : vector<64x64xbf16>, vector<64x128xbf16>, vector<64x128xf32> -> vector<64x128xf32>
    %c0_3 = arith.constant 0 : index
    %c0_4 = arith.constant 0 : index
    %3 = vector.load %arg3[%c0_3, %c0_4] : memref<8x128xf32, #tpu.memory_space<vmem>>, vector<1x128xf32>
    %4 = vector.broadcast %3 : vector<1x128xf32> to vector<64x128xf32>
    %5 = arith.addf %2, %4 : vector<64x128xf32>
    %cst_5 = arith.constant 0.000000e+00 : f32
    %6 = vector.broadcast %cst_5 : f32 to vector<64x128xf32>
    %7 = arith.cmpf oge, %5, %6 : vector<64x128xf32>
    %cst_6 = arith.constant 0.00999999977 : f32
    %8 = vector.broadcast %cst_6 : f32 to vector<64x128xf32>
    %9 = arith.mulf %8, %5 : vector<64x128xf32>
    %10 = arith.select %7, %5, %9 : vector<64x128xi1>, vector<64x128xf32>
    %11 = arith.truncf %10 : vector<64x128xf32> to vector<64x128xbf16>
    %12 = vector.extract_strided_slice %11 {offsets = [0, 0], sizes = [64, 32], strides = [1, 1]} : vector<64x128xbf16> to vector<64x32xbf16>
    %c0_7 = arith.constant 0 : index
    %c0_8 = arith.constant 0 : index
    %13 = vector.load %arg2[%c0_7, %c0_8] : memref<928x64xbf16, #tpu.memory_space<vmem>>, vector<288x64xbf16>
    %cst_9 = arith.constant dense<0.000000e+00> : vector<288x32xf32>
    %14 = tpu.matmul %13, %12, %cst_9 {dimension_numbers = #tpu.dot_dimension_numbers<[1], [0], [0], [1], [0, 0, 1, 1], [], []>} : vector<288x64xbf16>, vector<64x32xbf16>, vector<288x32xf32> -> vector<288x32xf32>
    %15 = arith.truncf %14 : vector<288x32xf32> to vector<288x32xbf16>
    %c64 = arith.constant 64 : index
    %c0_10 = arith.constant 0 : index
    %16 = vector.load %arg1[%c64, %c0_10] : memref<816x128xbf16, #tpu.memory_space<vmem>>, vector<32x128xbf16>
    %17 = vector.extract_strided_slice %15 {offsets = [0, 0], sizes = [32, 32], strides = [1, 1]} : vector<288x32xbf16> to vector<32x32xbf16>
    %cst_11 = arith.constant dense<0.000000e+00> : vector<32x128xf32>
    %18 = tpu.matmul %17, %16, %cst_11 {dimension_numbers = #tpu.dot_dimension_numbers<[1], [0], [0], [1], [0, 0, 1, 1], [], []>} : vector<32x32xbf16>, vector<32x128xbf16>, vector<32x128xf32> -> vector<32x128xf32>
    %c96 = arith.constant 96 : index
    %c0_12 = arith.constant 0 : index
    %19 = vector.load %arg1[%c96, %c0_12] : memref<816x128xbf16, #tpu.memory_space<vmem>>, vector<32x128xbf16>
    %20 = vector.extract_strided_slice %15 {offsets = [32, 0], sizes = [32, 32], strides = [1, 1]} : vector<288x32xbf16> to vector<32x32xbf16>
    %cst_13 = arith.constant dense<0.000000e+00> : vector<32x128xf32>
    %21 = tpu.matmul %20, %19, %cst_13 {dimension_numbers = #tpu.dot_dimension_numbers<[1], [0], [0], [1], [0, 0, 1, 1], [], []>} : vector<32x32xbf16>, vector<32x128xbf16>, vector<32x128xf32> -> vector<32x128xf32>
    %22 = arith.addf %18, %21 : vector<32x128xf32>
    %c128 = arith.constant 128 : index
    %c0_14 = arith.constant 0 : index
    %23 = vector.load %arg1[%c128, %c0_14] : memref<816x128xbf16, #tpu.memory_space<vmem>>, vector<32x128xbf16>
    %24 = vector.extract_strided_slice %15 {offsets = [64, 0], sizes = [32, 32], strides = [1, 1]} : vector<288x32xbf16> to vector<32x32xbf16>
    %cst_15 = arith.constant dense<0.000000e+00> : vector<32x128xf32>
    %25 = tpu.matmul %24, %23, %cst_15 {dimension_numbers = #tpu.dot_dimension_numbers<[1], [0], [0], [1], [0, 0, 1, 1], [], []>} : vector<32x32xbf16>, vector<32x128xbf16>, vector<32x128xf32> -> vector<32x128xf32>
    %26 = arith.addf %22, %25 : vector<32x128xf32>
    %c160 = arith.constant 160 : index
    %c0_16 = arith.constant 0 : index
    %27 = vector.load %arg1[%c160, %c0_16] : memref<816x128xbf16, #tpu.memory_space<vmem>>, vector<32x128xbf16>
    %28 = vector.extract_strided_slice %15 {offsets = [96, 0], sizes = [32, 32], strides = [1, 1]} : vector<288x32xbf16> to vector<32x32xbf16>
    %cst_17 = arith.constant dense<0.000000e+00> : vector<32x128xf32>
    %29 = tpu.matmul %28, %27, %cst_17 {dimension_numbers = #tpu.dot_dimension_numbers<[1], [0], [0], [1], [0, 0, 1, 1], [], []>} : vector<32x32xbf16>, vector<32x128xbf16>, vector<32x128xf32> -> vector<32x128xf32>
    %30 = arith.addf %26, %29 : vector<32x128xf32>
    %c192 = arith.constant 192 : index
    %c0_18 = arith.constant 0 : index
    %31 = vector.load %arg1[%c192, %c0_18] : memref<816x128xbf16, #tpu.memory_space<vmem>>, vector<32x128xbf16>
    %32 = vector.extract_strided_slice %15 {offsets = [128, 0], sizes = [32, 32], strides = [1, 1]} : vector<288x32xbf16> to vector<32x32xbf16>
    %cst_19 = arith.constant dense<0.000000e+00> : vector<32x128xf32>
    %33 = tpu.matmul %32, %31, %cst_19 {dimension_numbers = #tpu.dot_dimension_numbers<[1], [0], [0], [1], [0, 0, 1, 1], [], []>} : vector<32x32xbf16>, vector<32x128xbf16>, vector<32x128xf32> -> vector<32x128xf32>
    %34 = arith.addf %30, %33 : vector<32x128xf32>
    %c224 = arith.constant 224 : index
    %c0_20 = arith.constant 0 : index
    %35 = vector.load %arg1[%c224, %c0_20] : memref<816x128xbf16, #tpu.memory_space<vmem>>, vector<32x128xbf16>
    %36 = vector.extract_strided_slice %15 {offsets = [160, 0], sizes = [32, 32], strides = [1, 1]} : vector<288x32xbf16> to vector<32x32xbf16>
    %cst_21 = arith.constant dense<0.000000e+00> : vector<32x128xf32>
    %37 = tpu.matmul %36, %35, %cst_21 {dimension_numbers = #tpu.dot_dimension_numbers<[1], [0], [0], [1], [0, 0, 1, 1], [], []>} : vector<32x32xbf16>, vector<32x128xbf16>, vector<32x128xf32> -> vector<32x128xf32>
    %38 = arith.addf %34, %37 : vector<32x128xf32>
    %c256 = arith.constant 256 : index
    %c0_22 = arith.constant 0 : index
    %39 = vector.load %arg1[%c256, %c0_22] : memref<816x128xbf16, #tpu.memory_space<vmem>>, vector<32x128xbf16>
    %40 = vector.extract_strided_slice %15 {offsets = [192, 0], sizes = [32, 32], strides = [1, 1]} : vector<288x32xbf16> to vector<32x32xbf16>
    %cst_23 = arith.constant dense<0.000000e+00> : vector<32x128xf32>
    %41 = tpu.matmul %40, %39, %cst_23 {dimension_numbers = #tpu.dot_dimension_numbers<[1], [0], [0], [1], [0, 0, 1, 1], [], []>} : vector<32x32xbf16>, vector<32x128xbf16>, vector<32x128xf32> -> vector<32x128xf32>
    %42 = arith.addf %38, %41 : vector<32x128xf32>
    %c288 = arith.constant 288 : index
    %c0_24 = arith.constant 0 : index
    %43 = vector.load %arg1[%c288, %c0_24] : memref<816x128xbf16, #tpu.memory_space<vmem>>, vector<32x128xbf16>
    %44 = vector.extract_strided_slice %15 {offsets = [224, 0], sizes = [32, 32], strides = [1, 1]} : vector<288x32xbf16> to vector<32x32xbf16>
    %cst_25 = arith.constant dense<0.000000e+00> : vector<32x128xf32>
    %45 = tpu.matmul %44, %43, %cst_25 {dimension_numbers = #tpu.dot_dimension_numbers<[1], [0], [0], [1], [0, 0, 1, 1], [], []>} : vector<32x32xbf16>, vector<32x128xbf16>, vector<32x128xf32> -> vector<32x128xf32>
    %46 = arith.addf %42, %45 : vector<32x128xf32>
    %c320 = arith.constant 320 : index
    %c0_26 = arith.constant 0 : index
    %47 = vector.load %arg1[%c320, %c0_26] : memref<816x128xbf16, #tpu.memory_space<vmem>>, vector<32x128xbf16>
    %48 = vector.extract_strided_slice %15 {offsets = [256, 0], sizes = [32, 32], strides = [1, 1]} : vector<288x32xbf16> to vector<32x32xbf16>
    %cst_27 = arith.constant dense<0.000000e+00> : vector<32x128xf32>
    %49 = tpu.matmul %48, %47, %cst_27 {dimension_numbers = #tpu.dot_dimension_numbers<[1], [0], [0], [1], [0, 0, 1, 1], [], []>} : vector<32x32xbf16>, vector<32x128xbf16>, vector<32x128xf32> -> vector<32x128xf32>
    %50 = arith.addf %46, %49 : vector<32x128xf32>
    %c1 = arith.constant 1 : index
    %c0_28 = arith.constant 0 : index
    %51 = vector.load %arg3[%c1, %c0_28] : memref<8x128xf32, #tpu.memory_space<vmem>>, vector<1x128xf32>
    %52 = vector.broadcast %51 : vector<1x128xf32> to vector<32x128xf32>
    %53 = arith.addf %50, %52 : vector<32x128xf32>
    %cst_29 = arith.constant 0.000000e+00 : f32
    %54 = vector.broadcast %cst_29 : f32 to vector<32x128xf32>
    %55 = arith.cmpf oge, %53, %54 : vector<32x128xf32>
    %cst_30 = arith.constant 0.00999999977 : f32
    %56 = vector.broadcast %cst_30 : f32 to vector<32x128xf32>
    %57 = arith.mulf %56, %53 : vector<32x128xf32>
    %58 = arith.select %55, %53, %57 : vector<32x128xi1>, vector<32x128xf32>
    %59 = arith.truncf %58 : vector<32x128xf32> to vector<32x128xbf16>
    %60 = vector.extract_strided_slice %59 {offsets = [0, 0], sizes = [32, 48], strides = [1, 1]} : vector<32x128xbf16> to vector<32x48xbf16>
    %c288_31 = arith.constant 288 : index
    %c0_32 = arith.constant 0 : index
    %61 = vector.load %arg2[%c288_31, %c0_32] : memref<928x64xbf16, #tpu.memory_space<vmem>>, vector<288x32xbf16>
    %cst_33 = arith.constant dense<0.000000e+00> : vector<288x48xf32>
    %62 = tpu.matmul %61, %60, %cst_33 {dimension_numbers = #tpu.dot_dimension_numbers<[1], [0], [0], [1], [0, 0, 1, 1], [], []>} : vector<288x32xbf16>, vector<32x48xbf16>, vector<288x48xf32> -> vector<288x48xf32>
    %63 = arith.truncf %62 : vector<288x48xf32> to vector<288x48xbf16>
    %c352 = arith.constant 352 : index
    %c0_34 = arith.constant 0 : index
    %64 = vector.load %arg1[%c352, %c0_34] : memref<816x128xbf16, #tpu.memory_space<vmem>>, vector<48x128xbf16>
    %65 = vector.extract_strided_slice %63 {offsets = [0, 0], sizes = [32, 48], strides = [1, 1]} : vector<288x48xbf16> to vector<32x48xbf16>
    %cst_35 = arith.constant dense<0.000000e+00> : vector<32x128xf32>
    %66 = tpu.matmul %65, %64, %cst_35 {dimension_numbers = #tpu.dot_dimension_numbers<[1], [0], [0], [1], [0, 0, 1, 1], [], []>} : vector<32x48xbf16>, vector<48x128xbf16>, vector<32x128xf32> -> vector<32x128xf32>
    %c400 = arith.constant 400 : index
    %c0_36 = arith.constant 0 : index
    %67 = vector.load %arg1[%c400, %c0_36] : memref<816x128xbf16, #tpu.memory_space<vmem>>, vector<48x128xbf16>
    %68 = vector.extract_strided_slice %63 {offsets = [32, 0], sizes = [32, 48], strides = [1, 1]} : vector<288x48xbf16> to vector<32x48xbf16>
    %cst_37 = arith.constant dense<0.000000e+00> : vector<32x128xf32>
    %69 = tpu.matmul %68, %67, %cst_37 {dimension_numbers = #tpu.dot_dimension_numbers<[1], [0], [0], [1], [0, 0, 1, 1], [], []>} : vector<32x48xbf16>, vector<48x128xbf16>, vector<32x128xf32> -> vector<32x128xf32>
    %70 = arith.addf %66, %69 : vector<32x128xf32>
    %c448 = arith.constant 448 : index
    %c0_38 = arith.constant 0 : index
    %71 = vector.load %arg1[%c448, %c0_38] : memref<816x128xbf16, #tpu.memory_space<vmem>>, vector<48x128xbf16>
    %72 = vector.extract_strided_slice %63 {offsets = [64, 0], sizes = [32, 48], strides = [1, 1]} : vector<288x48xbf16> to vector<32x48xbf16>
    %cst_39 = arith.constant dense<0.000000e+00> : vector<32x128xf32>
    %73 = tpu.matmul %72, %71, %cst_39 {dimension_numbers = #tpu.dot_dimension_numbers<[1], [0], [0], [1], [0, 0, 1, 1], [], []>} : vector<32x48xbf16>, vector<48x128xbf16>, vector<32x128xf32> -> vector<32x128xf32>
    %74 = arith.addf %70, %73 : vector<32x128xf32>
    %c496 = arith.constant 496 : index
    %c0_40 = arith.constant 0 : index
    %75 = vector.load %arg1[%c496, %c0_40] : memref<816x128xbf16, #tpu.memory_space<vmem>>, vector<48x128xbf16>
    %76 = vector.extract_strided_slice %63 {offsets = [96, 0], sizes = [32, 48], strides = [1, 1]} : vector<288x48xbf16> to vector<32x48xbf16>
    %cst_41 = arith.constant dense<0.000000e+00> : vector<32x128xf32>
    %77 = tpu.matmul %76, %75, %cst_41 {dimension_numbers = #tpu.dot_dimension_numbers<[1], [0], [0], [1], [0, 0, 1, 1], [], []>} : vector<32x48xbf16>, vector<48x128xbf16>, vector<32x128xf32> -> vector<32x128xf32>
    %78 = arith.addf %74, %77 : vector<32x128xf32>
    %c544 = arith.constant 544 : index
    %c0_42 = arith.constant 0 : index
    %79 = vector.load %arg1[%c544, %c0_42] : memref<816x128xbf16, #tpu.memory_space<vmem>>, vector<48x128xbf16>
    %80 = vector.extract_strided_slice %63 {offsets = [128, 0], sizes = [32, 48], strides = [1, 1]} : vector<288x48xbf16> to vector<32x48xbf16>
    %cst_43 = arith.constant dense<0.000000e+00> : vector<32x128xf32>
    %81 = tpu.matmul %80, %79, %cst_43 {dimension_numbers = #tpu.dot_dimension_numbers<[1], [0], [0], [1], [0, 0, 1, 1], [], []>} : vector<32x48xbf16>, vector<48x128xbf16>, vector<32x128xf32> -> vector<32x128xf32>
    %82 = arith.addf %78, %81 : vector<32x128xf32>
    %c592 = arith.constant 592 : index
    %c0_44 = arith.constant 0 : index
    %83 = vector.load %arg1[%c592, %c0_44] : memref<816x128xbf16, #tpu.memory_space<vmem>>, vector<48x128xbf16>
    %84 = vector.extract_strided_slice %63 {offsets = [160, 0], sizes = [32, 48], strides = [1, 1]} : vector<288x48xbf16> to vector<32x48xbf16>
    %cst_45 = arith.constant dense<0.000000e+00> : vector<32x128xf32>
    %85 = tpu.matmul %84, %83, %cst_45 {dimension_numbers = #tpu.dot_dimension_numbers<[1], [0], [0], [1], [0, 0, 1, 1], [], []>} : vector<32x48xbf16>, vector<48x128xbf16>, vector<32x128xf32> -> vector<32x128xf32>
    %86 = arith.addf %82, %85 : vector<32x128xf32>
    %c640 = arith.constant 640 : index
    %c0_46 = arith.constant 0 : index
    %87 = vector.load %arg1[%c640, %c0_46] : memref<816x128xbf16, #tpu.memory_space<vmem>>, vector<48x128xbf16>
    %88 = vector.extract_strided_slice %63 {offsets = [192, 0], sizes = [32, 48], strides = [1, 1]} : vector<288x48xbf16> to vector<32x48xbf16>
    %cst_47 = arith.constant dense<0.000000e+00> : vector<32x128xf32>
    %89 = tpu.matmul %88, %87, %cst_47 {dimension_numbers = #tpu.dot_dimension_numbers<[1], [0], [0], [1], [0, 0, 1, 1], [], []>} : vector<32x48xbf16>, vector<48x128xbf16>, vector<32x128xf32> -> vector<32x128xf32>
    %90 = arith.addf %86, %89 : vector<32x128xf32>
    %c688 = arith.constant 688 : index
    %c0_48 = arith.constant 0 : index
    %91 = vector.load %arg1[%c688, %c0_48] : memref<816x128xbf16, #tpu.memory_space<vmem>>, vector<48x128xbf16>
    %92 = vector.extract_strided_slice %63 {offsets = [224, 0], sizes = [32, 48], strides = [1, 1]} : vector<288x48xbf16> to vector<32x48xbf16>
    %cst_49 = arith.constant dense<0.000000e+00> : vector<32x128xf32>
    %93 = tpu.matmul %92, %91, %cst_49 {dimension_numbers = #tpu.dot_dimension_numbers<[1], [0], [0], [1], [0, 0, 1, 1], [], []>} : vector<32x48xbf16>, vector<48x128xbf16>, vector<32x128xf32> -> vector<32x128xf32>
    %94 = arith.addf %90, %93 : vector<32x128xf32>
    %c736 = arith.constant 736 : index
    %c0_50 = arith.constant 0 : index
    %95 = vector.load %arg1[%c736, %c0_50] : memref<816x128xbf16, #tpu.memory_space<vmem>>, vector<48x128xbf16>
    %96 = vector.extract_strided_slice %63 {offsets = [256, 0], sizes = [32, 48], strides = [1, 1]} : vector<288x48xbf16> to vector<32x48xbf16>
    %cst_51 = arith.constant dense<0.000000e+00> : vector<32x128xf32>
    %97 = tpu.matmul %96, %95, %cst_51 {dimension_numbers = #tpu.dot_dimension_numbers<[1], [0], [0], [1], [0, 0, 1, 1], [], []>} : vector<32x48xbf16>, vector<48x128xbf16>, vector<32x128xf32> -> vector<32x128xf32>
    %98 = arith.addf %94, %97 : vector<32x128xf32>
    %c2 = arith.constant 2 : index
    %c0_52 = arith.constant 0 : index
    %99 = vector.load %arg3[%c2, %c0_52] : memref<8x128xf32, #tpu.memory_space<vmem>>, vector<1x128xf32>
    %100 = vector.broadcast %99 : vector<1x128xf32> to vector<32x128xf32>
    %101 = arith.addf %98, %100 : vector<32x128xf32>
    %cst_53 = arith.constant 0.000000e+00 : f32
    %102 = vector.broadcast %cst_53 : f32 to vector<32x128xf32>
    %103 = arith.cmpf oge, %101, %102 : vector<32x128xf32>
    %cst_54 = arith.constant 0.00999999977 : f32
    %104 = vector.broadcast %cst_54 : f32 to vector<32x128xf32>
    %105 = arith.mulf %104, %101 : vector<32x128xf32>
    %106 = arith.select %103, %101, %105 : vector<32x128xi1>, vector<32x128xf32>
    %107 = vector.extract_strided_slice %11 {offsets = [0, 0], sizes = [64, 32], strides = [1, 1]} : vector<64x128xbf16> to vector<64x32xbf16>
    %c576 = arith.constant 576 : index
    %c0_55 = arith.constant 0 : index
    %108 = vector.load %arg2[%c576, %c0_55] : memref<928x64xbf16, #tpu.memory_space<vmem>>, vector<32x64xbf16>
    %cst_56 = arith.constant dense<0.000000e+00> : vector<32x32xf32>
    %109 = tpu.matmul %108, %107, %cst_56 {dimension_numbers = #tpu.dot_dimension_numbers<[1], [0], [0], [1], [0, 0, 1, 1], [], []>} : vector<32x64xbf16>, vector<64x32xbf16>, vector<32x32xf32> -> vector<32x32xf32>
    %110 = arith.truncf %109 : vector<32x32xf32> to vector<32x32xbf16>
    %c784 = arith.constant 784 : index
    %c0_57 = arith.constant 0 : index
    %111 = vector.load %arg1[%c784, %c0_57] : memref<816x128xbf16, #tpu.memory_space<vmem>>, vector<32x128xbf16>
    %cst_58 = arith.constant dense<0.000000e+00> : vector<32x128xf32>
    %112 = tpu.matmul %110, %111, %cst_58 {dimension_numbers = #tpu.dot_dimension_numbers<[1], [0], [0], [1], [0, 0, 1, 1], [], []>} : vector<32x32xbf16>, vector<32x128xbf16>, vector<32x128xf32> -> vector<32x128xf32>
    %113 = arith.addf %106, %112 : vector<32x128xf32>
    %cst_59 = arith.constant 0.000000e+00 : f32
    %114 = vector.broadcast %cst_59 : f32 to vector<32x128xf32>
    %115 = arith.cmpf oge, %113, %114 : vector<32x128xf32>
    %cst_60 = arith.constant 0.00999999977 : f32
    %116 = vector.broadcast %cst_60 : f32 to vector<32x128xf32>
    %117 = arith.mulf %116, %113 : vector<32x128xf32>
    %118 = arith.select %115, %113, %117 : vector<32x128xi1>, vector<32x128xf32>
    %119 = arith.truncf %118 : vector<32x128xf32> to vector<32x128xbf16>
    tpu.wait_dma2 semaphore(%arg7 : memref<!tpu.dma_semaphore, #tpu.memory_space<semaphore_mem>>) src(%arg4 : memref<1440x128xbf16, #tpu.memory_space<any>>) dst(%arg6 : memref<1440x128xbf16, #tpu.memory_space<vmem>>)
    %120 = vector.extract_strided_slice %119 {offsets = [0, 0], sizes = [32, 48], strides = [1, 1]} : vector<32x128xbf16> to vector<32x48xbf16>
    %c608 = arith.constant 608 : index
    %c0_61 = arith.constant 0 : index
    %121 = vector.load %arg2[%c608, %c0_61] : memref<928x64xbf16, #tpu.memory_space<vmem>>, vector<144x32xbf16>
    %cst_62 = arith.constant dense<0.000000e+00> : vector<144x48xf32>
    %122 = tpu.matmul %121, %120, %cst_62 {dimension_numbers = #tpu.dot_dimension_numbers<[1], [0], [0], [1], [0, 0, 1, 1], [], []>} : vector<144x32xbf16>, vector<32x48xbf16>, vector<144x48xf32> -> vector<144x48xf32>
    %123 = arith.truncf %122 : vector<144x48xf32> to vector<144x48xbf16>
    %c0_63 = arith.constant 0 : index
    %c0_64 = arith.constant 0 : index
    %124 = vector.load %arg6[%c0_63, %c0_64] : memref<1440x128xbf16, #tpu.memory_space<vmem>>, vector<48x128xbf16>
    %125 = vector.extract_strided_slice %123 {offsets = [0, 0], sizes = [16, 48], strides = [1, 1]} : vector<144x48xbf16> to vector<16x48xbf16>
    %cst_65 = arith.constant dense<0.000000e+00> : vector<16x128xf32>
    %126 = tpu.matmul %125, %124, %cst_65 {dimension_numbers = #tpu.dot_dimension_numbers<[1], [0], [0], [1], [0, 0, 1, 1], [], []>} : vector<16x48xbf16>, vector<48x128xbf16>, vector<16x128xf32> -> vector<16x128xf32>
    %c48 = arith.constant 48 : index
    %c0_66 = arith.constant 0 : index
    %127 = vector.load %arg6[%c48, %c0_66] : memref<1440x128xbf16, #tpu.memory_space<vmem>>, vector<48x128xbf16>
    %128 = vector.extract_strided_slice %123 {offsets = [16, 0], sizes = [16, 48], strides = [1, 1]} : vector<144x48xbf16> to vector<16x48xbf16>
    %cst_67 = arith.constant dense<0.000000e+00> : vector<16x128xf32>
    %129 = tpu.matmul %128, %127, %cst_67 {dimension_numbers = #tpu.dot_dimension_numbers<[1], [0], [0], [1], [0, 0, 1, 1], [], []>} : vector<16x48xbf16>, vector<48x128xbf16>, vector<16x128xf32> -> vector<16x128xf32>
    %130 = arith.addf %126, %129 : vector<16x128xf32>
    %c96_68 = arith.constant 96 : index
    %c0_69 = arith.constant 0 : index
    %131 = vector.load %arg6[%c96_68, %c0_69] : memref<1440x128xbf16, #tpu.memory_space<vmem>>, vector<48x128xbf16>
    %132 = vector.extract_strided_slice %123 {offsets = [32, 0], sizes = [16, 48], strides = [1, 1]} : vector<144x48xbf16> to vector<16x48xbf16>
    %cst_70 = arith.constant dense<0.000000e+00> : vector<16x128xf32>
    %133 = tpu.matmul %132, %131, %cst_70 {dimension_numbers = #tpu.dot_dimension_numbers<[1], [0], [0], [1], [0, 0, 1, 1], [], []>} : vector<16x48xbf16>, vector<48x128xbf16>, vector<16x128xf32> -> vector<16x128xf32>
    %134 = arith.addf %130, %133 : vector<16x128xf32>
    %c144 = arith.constant 144 : index
    %c0_71 = arith.constant 0 : index
    %135 = vector.load %arg6[%c144, %c0_71] : memref<1440x128xbf16, #tpu.memory_space<vmem>>, vector<48x128xbf16>
    %136 = vector.extract_strided_slice %123 {offsets = [48, 0], sizes = [16, 48], strides = [1, 1]} : vector<144x48xbf16> to vector<16x48xbf16>
    %cst_72 = arith.constant dense<0.000000e+00> : vector<16x128xf32>
    %137 = tpu.matmul %136, %135, %cst_72 {dimension_numbers = #tpu.dot_dimension_numbers<[1], [0], [0], [1], [0, 0, 1, 1], [], []>} : vector<16x48xbf16>, vector<48x128xbf16>, vector<16x128xf32> -> vector<16x128xf32>
    %138 = arith.addf %134, %137 : vector<16x128xf32>
    %c192_73 = arith.constant 192 : index
    %c0_74 = arith.constant 0 : index
    %139 = vector.load %arg6[%c192_73, %c0_74] : memref<1440x128xbf16, #tpu.memory_space<vmem>>, vector<48x128xbf16>
    %140 = vector.extract_strided_slice %123 {offsets = [64, 0], sizes = [16, 48], strides = [1, 1]} : vector<144x48xbf16> to vector<16x48xbf16>
    %cst_75 = arith.constant dense<0.000000e+00> : vector<16x128xf32>
    %141 = tpu.matmul %140, %139, %cst_75 {dimension_numbers = #tpu.dot_dimension_numbers<[1], [0], [0], [1], [0, 0, 1, 1], [], []>} : vector<16x48xbf16>, vector<48x128xbf16>, vector<16x128xf32> -> vector<16x128xf32>
    %142 = arith.addf %138, %141 : vector<16x128xf32>
    %c240 = arith.constant 240 : index
    %c0_76 = arith.constant 0 : index
    %143 = vector.load %arg6[%c240, %c0_76] : memref<1440x128xbf16, #tpu.memory_space<vmem>>, vector<48x128xbf16>
    %144 = vector.extract_strided_slice %123 {offsets = [80, 0], sizes = [16, 48], strides = [1, 1]} : vector<144x48xbf16> to vector<16x48xbf16>
    %cst_77 = arith.constant dense<0.000000e+00> : vector<16x128xf32>
    %145 = tpu.matmul %144, %143, %cst_77 {dimension_numbers = #tpu.dot_dimension_numbers<[1], [0], [0], [1], [0, 0, 1, 1], [], []>} : vector<16x48xbf16>, vector<48x128xbf16>, vector<16x128xf32> -> vector<16x128xf32>
    %146 = arith.addf %142, %145 : vector<16x128xf32>
    %c288_78 = arith.constant 288 : index
    %c0_79 = arith.constant 0 : index
    %147 = vector.load %arg6[%c288_78, %c0_79] : memref<1440x128xbf16, #tpu.memory_space<vmem>>, vector<48x128xbf16>
    %148 = vector.extract_strided_slice %123 {offsets = [96, 0], sizes = [16, 48], strides = [1, 1]} : vector<144x48xbf16> to vector<16x48xbf16>
    %cst_80 = arith.constant dense<0.000000e+00> : vector<16x128xf32>
    %149 = tpu.matmul %148, %147, %cst_80 {dimension_numbers = #tpu.dot_dimension_numbers<[1], [0], [0], [1], [0, 0, 1, 1], [], []>} : vector<16x48xbf16>, vector<48x128xbf16>, vector<16x128xf32> -> vector<16x128xf32>
    %150 = arith.addf %146, %149 : vector<16x128xf32>
    %c336 = arith.constant 336 : index
    %c0_81 = arith.constant 0 : index
    %151 = vector.load %arg6[%c336, %c0_81] : memref<1440x128xbf16, #tpu.memory_space<vmem>>, vector<48x128xbf16>
    %152 = vector.extract_strided_slice %123 {offsets = [112, 0], sizes = [16, 48], strides = [1, 1]} : vector<144x48xbf16> to vector<16x48xbf16>
    %cst_82 = arith.constant dense<0.000000e+00> : vector<16x128xf32>
    %153 = tpu.matmul %152, %151, %cst_82 {dimension_numbers = #tpu.dot_dimension_numbers<[1], [0], [0], [1], [0, 0, 1, 1], [], []>} : vector<16x48xbf16>, vector<48x128xbf16>, vector<16x128xf32> -> vector<16x128xf32>
    %154 = arith.addf %150, %153 : vector<16x128xf32>
    %c384 = arith.constant 384 : index
    %c0_83 = arith.constant 0 : index
    %155 = vector.load %arg6[%c384, %c0_83] : memref<1440x128xbf16, #tpu.memory_space<vmem>>, vector<48x128xbf16>
    %156 = vector.extract_strided_slice %123 {offsets = [128, 0], sizes = [16, 48], strides = [1, 1]} : vector<144x48xbf16> to vector<16x48xbf16>
    %cst_84 = arith.constant dense<0.000000e+00> : vector<16x128xf32>
    %157 = tpu.matmul %156, %155, %cst_84 {dimension_numbers = #tpu.dot_dimension_numbers<[1], [0], [0], [1], [0, 0, 1, 1], [], []>} : vector<16x48xbf16>, vector<48x128xbf16>, vector<16x128xf32> -> vector<16x128xf32>
    %158 = arith.addf %154, %157 : vector<16x128xf32>
    %c3 = arith.constant 3 : index
    %c0_85 = arith.constant 0 : index
    %159 = vector.load %arg3[%c3, %c0_85] : memref<8x128xf32, #tpu.memory_space<vmem>>, vector<1x128xf32>
    %160 = vector.broadcast %159 : vector<1x128xf32> to vector<16x128xf32>
    %161 = arith.addf %158, %160 : vector<16x128xf32>
    %cst_86 = arith.constant 0.000000e+00 : f32
    %162 = vector.broadcast %cst_86 : f32 to vector<16x128xf32>
    %163 = arith.cmpf oge, %161, %162 : vector<16x128xf32>
    %cst_87 = arith.constant 0.00999999977 : f32
    %164 = vector.broadcast %cst_87 : f32 to vector<16x128xf32>
    %165 = arith.mulf %164, %161 : vector<16x128xf32>
    %166 = arith.select %163, %161, %165 : vector<16x128xi1>, vector<16x128xf32>
    %167 = arith.truncf %166 : vector<16x128xf32> to vector<16x128xbf16>
    %168 = vector.extract_strided_slice %167 {offsets = [0, 0], sizes = [16, 96], strides = [1, 1]} : vector<16x128xbf16> to vector<16x96xbf16>
    %c752 = arith.constant 752 : index
    %c0_88 = arith.constant 0 : index
    %169 = vector.load %arg2[%c752, %c0_88] : memref<928x64xbf16, #tpu.memory_space<vmem>>, vector<144x16xbf16>
    %cst_89 = arith.constant dense<0.000000e+00> : vector<144x96xf32>
    %170 = tpu.matmul %169, %168, %cst_89 {dimension_numbers = #tpu.dot_dimension_numbers<[1], [0], [0], [1], [0, 0, 1, 1], [], []>} : vector<144x16xbf16>, vector<16x96xbf16>, vector<144x96xf32> -> vector<144x96xf32>
    %171 = arith.truncf %170 : vector<144x96xf32> to vector<144x96xbf16>
    %c432 = arith.constant 432 : index
    %c0_90 = arith.constant 0 : index
    %172 = vector.load %arg6[%c432, %c0_90] : memref<1440x128xbf16, #tpu.memory_space<vmem>>, vector<96x128xbf16>
    %173 = vector.extract_strided_slice %171 {offsets = [0, 0], sizes = [16, 96], strides = [1, 1]} : vector<144x96xbf16> to vector<16x96xbf16>
    %cst_91 = arith.constant dense<0.000000e+00> : vector<16x128xf32>
    %174 = tpu.matmul %173, %172, %cst_91 {dimension_numbers = #tpu.dot_dimension_numbers<[1], [0], [0], [1], [0, 0, 1, 1], [], []>} : vector<16x96xbf16>, vector<96x128xbf16>, vector<16x128xf32> -> vector<16x128xf32>
    %c528 = arith.constant 528 : index
    %c0_92 = arith.constant 0 : index
    %175 = vector.load %arg6[%c528, %c0_92] : memref<1440x128xbf16, #tpu.memory_space<vmem>>, vector<96x128xbf16>
    %176 = vector.extract_strided_slice %171 {offsets = [16, 0], sizes = [16, 96], strides = [1, 1]} : vector<144x96xbf16> to vector<16x96xbf16>
    %cst_93 = arith.constant dense<0.000000e+00> : vector<16x128xf32>
    %177 = tpu.matmul %176, %175, %cst_93 {dimension_numbers = #tpu.dot_dimension_numbers<[1], [0], [0], [1], [0, 0, 1, 1], [], []>} : vector<16x96xbf16>, vector<96x128xbf16>, vector<16x128xf32> -> vector<16x128xf32>
    %178 = arith.addf %174, %177 : vector<16x128xf32>
    %c624 = arith.constant 624 : index
    %c0_94 = arith.constant 0 : index
    %179 = vector.load %arg6[%c624, %c0_94] : memref<1440x128xbf16, #tpu.memory_space<vmem>>, vector<96x128xbf16>
    %180 = vector.extract_strided_slice %171 {offsets = [32, 0], sizes = [16, 96], strides = [1, 1]} : vector<144x96xbf16> to vector<16x96xbf16>
    %cst_95 = arith.constant dense<0.000000e+00> : vector<16x128xf32>
    %181 = tpu.matmul %180, %179, %cst_95 {dimension_numbers = #tpu.dot_dimension_numbers<[1], [0], [0], [1], [0, 0, 1, 1], [], []>} : vector<16x96xbf16>, vector<96x128xbf16>, vector<16x128xf32> -> vector<16x128xf32>
    %182 = arith.addf %178, %181 : vector<16x128xf32>
    %c720 = arith.constant 720 : index
    %c0_96 = arith.constant 0 : index
    %183 = vector.load %arg6[%c720, %c0_96] : memref<1440x128xbf16, #tpu.memory_space<vmem>>, vector<96x128xbf16>
    %184 = vector.extract_strided_slice %171 {offsets = [48, 0], sizes = [16, 96], strides = [1, 1]} : vector<144x96xbf16> to vector<16x96xbf16>
    %cst_97 = arith.constant dense<0.000000e+00> : vector<16x128xf32>
    %185 = tpu.matmul %184, %183, %cst_97 {dimension_numbers = #tpu.dot_dimension_numbers<[1], [0], [0], [1], [0, 0, 1, 1], [], []>} : vector<16x96xbf16>, vector<96x128xbf16>, vector<16x128xf32> -> vector<16x128xf32>
    %186 = arith.addf %182, %185 : vector<16x128xf32>
    %c816 = arith.constant 816 : index
    %c0_98 = arith.constant 0 : index
    %187 = vector.load %arg6[%c816, %c0_98] : memref<1440x128xbf16, #tpu.memory_space<vmem>>, vector<96x128xbf16>
    %188 = vector.extract_strided_slice %171 {offsets = [64, 0], sizes = [16, 96], strides = [1, 1]} : vector<144x96xbf16> to vector<16x96xbf16>
    %cst_99 = arith.constant dense<0.000000e+00> : vector<16x128xf32>
    %189 = tpu.matmul %188, %187, %cst_99 {dimension_numbers = #tpu.dot_dimension_numbers<[1], [0], [0], [1], [0, 0, 1, 1], [], []>} : vector<16x96xbf16>, vector<96x128xbf16>, vector<16x128xf32> -> vector<16x128xf32>
    %190 = arith.addf %186, %189 : vector<16x128xf32>
    %c912 = arith.constant 912 : index
    %c0_100 = arith.constant 0 : index
    %191 = vector.load %arg6[%c912, %c0_100] : memref<1440x128xbf16, #tpu.memory_space<vmem>>, vector<96x128xbf16>
    %192 = vector.extract_strided_slice %171 {offsets = [80, 0], sizes = [16, 96], strides = [1, 1]} : vector<144x96xbf16> to vector<16x96xbf16>
    %cst_101 = arith.constant dense<0.000000e+00> : vector<16x128xf32>
    %193 = tpu.matmul %192, %191, %cst_101 {dimension_numbers = #tpu.dot_dimension_numbers<[1], [0], [0], [1], [0, 0, 1, 1], [], []>} : vector<16x96xbf16>, vector<96x128xbf16>, vector<16x128xf32> -> vector<16x128xf32>
    %194 = arith.addf %190, %193 : vector<16x128xf32>
    %c1008 = arith.constant 1008 : index
    %c0_102 = arith.constant 0 : index
    %195 = vector.load %arg6[%c1008, %c0_102] : memref<1440x128xbf16, #tpu.memory_space<vmem>>, vector<96x128xbf16>
    %196 = vector.extract_strided_slice %171 {offsets = [96, 0], sizes = [16, 96], strides = [1, 1]} : vector<144x96xbf16> to vector<16x96xbf16>
    %cst_103 = arith.constant dense<0.000000e+00> : vector<16x128xf32>
    %197 = tpu.matmul %196, %195, %cst_103 {dimension_numbers = #tpu.dot_dimension_numbers<[1], [0], [0], [1], [0, 0, 1, 1], [], []>} : vector<16x96xbf16>, vector<96x128xbf16>, vector<16x128xf32> -> vector<16x128xf32>
    %198 = arith.addf %194, %197 : vector<16x128xf32>
    %c1104 = arith.constant 1104 : index
    %c0_104 = arith.constant 0 : index
    %199 = vector.load %arg6[%c1104, %c0_104] : memref<1440x128xbf16, #tpu.memory_space<vmem>>, vector<96x128xbf16>
    %200 = vector.extract_strided_slice %171 {offsets = [112, 0], sizes = [16, 96], strides = [1, 1]} : vector<144x96xbf16> to vector<16x96xbf16>
    %cst_105 = arith.constant dense<0.000000e+00> : vector<16x128xf32>
    %201 = tpu.matmul %200, %199, %cst_105 {dimension_numbers = #tpu.dot_dimension_numbers<[1], [0], [0], [1], [0, 0, 1, 1], [], []>} : vector<16x96xbf16>, vector<96x128xbf16>, vector<16x128xf32> -> vector<16x128xf32>
    %202 = arith.addf %198, %201 : vector<16x128xf32>
    %c1200 = arith.constant 1200 : index
    %c0_106 = arith.constant 0 : index
    %203 = vector.load %arg6[%c1200, %c0_106] : memref<1440x128xbf16, #tpu.memory_space<vmem>>, vector<96x128xbf16>
    %204 = vector.extract_strided_slice %171 {offsets = [128, 0], sizes = [16, 96], strides = [1, 1]} : vector<144x96xbf16> to vector<16x96xbf16>
    %cst_107 = arith.constant dense<0.000000e+00> : vector<16x128xf32>
    %205 = tpu.matmul %204, %203, %cst_107 {dimension_numbers = #tpu.dot_dimension_numbers<[1], [0], [0], [1], [0, 0, 1, 1], [], []>} : vector<16x96xbf16>, vector<96x128xbf16>, vector<16x128xf32> -> vector<16x128xf32>
    %206 = arith.addf %202, %205 : vector<16x128xf32>
    %c4 = arith.constant 4 : index
    %c0_108 = arith.constant 0 : index
    %207 = vector.load %arg3[%c4, %c0_108] : memref<8x128xf32, #tpu.memory_space<vmem>>, vector<1x128xf32>
    %208 = vector.broadcast %207 : vector<1x128xf32> to vector<16x128xf32>
    %209 = arith.addf %206, %208 : vector<16x128xf32>
    %cst_109 = arith.constant 0.000000e+00 : f32
    %210 = vector.broadcast %cst_109 : f32 to vector<16x128xf32>
    %211 = arith.cmpf oge, %209, %210 : vector<16x128xf32>
    %cst_110 = arith.constant 0.00999999977 : f32
    %212 = vector.broadcast %cst_110 : f32 to vector<16x128xf32>
    %213 = arith.mulf %212, %209 : vector<16x128xf32>
    %214 = arith.select %211, %209, %213 : vector<16x128xi1>, vector<16x128xf32>
    %215 = vector.extract_strided_slice %119 {offsets = [0, 0], sizes = [32, 48], strides = [1, 1]} : vector<32x128xbf16> to vector<32x48xbf16>
    %c896 = arith.constant 896 : index
    %c0_111 = arith.constant 0 : index
    %216 = vector.load %arg2[%c896, %c0_111] : memref<928x64xbf16, #tpu.memory_space<vmem>>, vector<16x32xbf16>
    %cst_112 = arith.constant dense<0.000000e+00> : vector<16x48xf32>
    %217 = tpu.matmul %216, %215, %cst_112 {dimension_numbers = #tpu.dot_dimension_numbers<[1], [0], [0], [1], [0, 0, 1, 1], [], []>} : vector<16x32xbf16>, vector<32x48xbf16>, vector<16x48xf32> -> vector<16x48xf32>
    %218 = arith.truncf %217 : vector<16x48xf32> to vector<16x48xbf16>
    %c1296 = arith.constant 1296 : index
    %c0_113 = arith.constant 0 : index
    %219 = vector.load %arg6[%c1296, %c0_113] : memref<1440x128xbf16, #tpu.memory_space<vmem>>, vector<48x128xbf16>
    %cst_114 = arith.constant dense<0.000000e+00> : vector<16x128xf32>
    %220 = tpu.matmul %218, %219, %cst_114 {dimension_numbers = #tpu.dot_dimension_numbers<[1], [0], [0], [1], [0, 0, 1, 1], [], []>} : vector<16x48xbf16>, vector<48x128xbf16>, vector<16x128xf32> -> vector<16x128xf32>
    %221 = arith.addf %214, %220 : vector<16x128xf32>
    %cst_115 = arith.constant 0.000000e+00 : f32
    %222 = vector.broadcast %cst_115 : f32 to vector<16x128xf32>
    %223 = arith.cmpf oge, %221, %222 : vector<16x128xf32>
    %cst_116 = arith.constant 0.00999999977 : f32
    %224 = vector.broadcast %cst_116 : f32 to vector<16x128xf32>
    %225 = arith.mulf %224, %221 : vector<16x128xf32>
    %226 = arith.select %223, %221, %225 : vector<16x128xi1>, vector<16x128xf32>
    %227 = arith.truncf %226 : vector<16x128xf32> to vector<16x128xbf16>
    %c912_117 = arith.constant 912 : index
    %c0_118 = arith.constant 0 : index
    %228 = vector.load %arg2[%c912_117, %c0_118] : memref<928x64xbf16, #tpu.memory_space<vmem>>, vector<8x16xbf16>
    %cst_119 = arith.constant dense<0.000000e+00> : vector<8x128xf32>
    %229 = tpu.matmul %228, %227, %cst_119 {dimension_numbers = #tpu.dot_dimension_numbers<[1], [0], [0], [1], [0, 0, 1, 1], [], []>} : vector<8x16xbf16>, vector<16x128xbf16>, vector<8x128xf32> -> vector<8x128xf32>
    %230 = vector.extract_strided_slice %229 {offsets = [0, 0], sizes = [8, 96], strides = [1, 1]} : vector<8x128xf32> to vector<8x96xf32>
    %231 = arith.truncf %230 : vector<8x96xf32> to vector<8x96xbf16>
    %c1344 = arith.constant 1344 : index
    %c0_120 = arith.constant 0 : index
    %232 = vector.load %arg6[%c1344, %c0_120] : memref<1440x128xbf16, #tpu.memory_space<vmem>>, vector<96x128xbf16>
    %cst_121 = arith.constant dense<0.000000e+00> : vector<8x128xf32>
    %233 = tpu.matmul %231, %232, %cst_121 {dimension_numbers = #tpu.dot_dimension_numbers<[1], [0], [0], [1], [0, 0, 1, 1], [], []>} : vector<8x96xbf16>, vector<96x128xbf16>, vector<8x128xf32> -> vector<8x128xf32>
    %c5 = arith.constant 5 : index
    %c0_122 = arith.constant 0 : index
    %234 = vector.load %arg3[%c5, %c0_122] : memref<8x128xf32, #tpu.memory_space<vmem>>, vector<1x128xf32>
    %235 = vector.broadcast %234 : vector<1x128xf32> to vector<8x128xf32>
    %236 = arith.addf %233, %235 : vector<8x128xf32>
    %c0_123 = arith.constant 0 : index
    %c0_124 = arith.constant 0 : index
    %237 = vector.load %arg5[%c0_123, %c0_124] : memref<8x128xf32, #tpu.memory_space<vmem>>, vector<8x128xf32>
    tpu.vector_store %arg5[%c0_123, %c0_124], %236 {strides = array<i32>} : memref<8x128xf32, #tpu.memory_space<vmem>>, vector<8x128xf32>,
    return
  }
}

</mosaic_0001>

<bundles_post_ra>
// kernel: forward.1
= control target key start
LH: loop header
LB: loop body
LE: loop exit
PB: predicated region body
PF: predicated region fallthrough
CT: control target
= control target key end

     0   :  { %s6976_s0 = inlined_call_operand.vmem [shape: bf16[64,64], index: 0, kind: input, shape index: {}]   ;;  %s6977_s1 = inlined_call_operand.vmem [shape: bf16[816,128], index: 1, kind: input, shape index: {}]   ;;  %s6978_s2 = inlined_call_operand.vmem [shape: bf16[928,64], index: 2, kind: input, shape index: {}]   ;;  %s6979_s3 = inlined_call_operand.vmem [shape: f32[8,128], index: 3, kind: input, shape index: {}]   ;;  %s6980_s4 = inlined_call_operand.vmem [shape: bf16[1440,128], index: 4, kind: input, shape index: {}]   ;;  %s6981_s5 = inlined_call_operand.vmem [shape: f32[8,128], index: 5, kind: output, shape index: {}]  }
   0x1   :  { %v5713_v0 = vld [vmem:[%s6980_s4] sm:$0xff]  ;;  %v5718_v1 = vld [vmem:[%s6980_s4 + $0x8] sm:$0xff]  ;;  %v5723_v2 = vld [vmem:[%s6980_s4 + $0x10] sm:$0xff] }
   0x2   :  { %v5728_v3 = vld [vmem:[%s6980_s4 + $0x18] sm:$0xff]  ;;  %v5733_v4 = vld [vmem:[%s6980_s4 + $0x20] sm:$0xff]  ;;  %v5738_v5 = vld [vmem:[%s6980_s4 + $0x28] sm:$0xff] }
   0x3   :  { %v5743_v6 = vld [vmem:[%s6980_s4 + $0x30] sm:$0xff]  ;;  %v5748_v7 = vld [vmem:[%s6980_s4 + $0x38] sm:$0xff]  ;;  %v5753_v8 = vld [vmem:[%s6980_s4 + $0x40] sm:$0xff] }
   0x4   :  { %v5758_v9 = vld [vmem:[%s6980_s4 + $0x48] sm:$0xff]  ;;  %v5763_v10 = vld [vmem:[%s6980_s4 + $0x50] sm:$0xff]  ;;  %v5768_v11 = vld [vmem:[%s6980_s4 + $0x58] sm:$0xff] }
   0x5   :  { %v5773_v12 = vld [vmem:[%s6980_s4 + $0x60] sm:$0xff]  ;;  %v5778_v13 = vld [vmem:[%s6980_s4 + $0x68] sm:$0xff]  ;;  %v5783_v14 = vld [vmem:[%s6980_s4 + $0x70] sm:$0xff] }
   0x6   :  { %v5788_v15 = vld [vmem:[%s6980_s4 + $0x78] sm:$0xff]  ;;  %v5793_v16 = vld [vmem:[%s6980_s4 + $0x80] sm:$0xff]  ;;  %v5798_v17 = vld [vmem:[%s6980_s4 + $0x88] sm:$0xff] }
   0x7   :  { %v5803_v18 = vld [vmem:[%s6980_s4 + $0x90] sm:$0xff]  ;;  %v5808_v19 = vld [vmem:[%s6980_s4 + $0x98] sm:$0xff]  ;;  %v5813_v20 = vld [vmem:[%s6980_s4 + $0xa0] sm:$0xff] }
   0x8   :  { %v5818_v21 = vld [vmem:[%s6980_s4 + $0xa8] sm:$0xff]  ;;  %v5823_v22 = vld [vmem:[%s6980_s4 + $0xb0] sm:$0xff]  ;;  %v5828_v23 = vld [vmem:[%s6980_s4 + $0xb8] sm:$0xff] }
   0x9   :  { %v5833_v24 = vld [vmem:[%s6980_s4 + $0xc0] sm:$0xff]  ;;  %v5838_v25 = vld [vmem:[%s6980_s4 + $0xc8] sm:$0xff]  ;;  %v5843_v26 = vld [vmem:[%s6980_s4 + $0xd0] sm:$0xff] }
   0xa   :  { %v5848_v27 = vld [vmem:[%s6980_s4 + $0xd8] sm:$0xff]  ;;  %v5853_v28 = vld [vmem:[%s6980_s4 + $0xe0] sm:$0xff]  ;;  %v5858_v29 = vld [vmem:[%s6980_s4 + $0xe8] sm:$0xff] }
   0xb   :  { %6982 = vst [vmem:[#allocation6_spill] sm:$0xff] %v5848_v27  ;;  %6983 = vst [vmem:[#allocation7_spill] sm:$0xff] %v5853_v28  ;;  %v5863_v30 = vld [vmem:[%s6980_s4 + $0xf0] sm:$0xff]  ;;  %v5868_v31 = vld [vmem:[%s6980_s4 + $0xf8] sm:$0xff] }
   0xc   :  { %6984 = vst [vmem:[#allocation8_spill] sm:$0xff] %v5858_v29  ;;  %6985 = vst [vmem:[#allocation9_spill] sm:$0xff] %v5863_v30  ;;  %v5873_v32 = vld [vmem:[%s6980_s4 + $0x100] sm:$0xff]  ;;  %v5878_v33 = vld [vmem:[%s6980_s4 + $0x108] sm:$0xff] }
   0xd   :  { %6986 = vst [vmem:[#allocation10_spill] sm:$0xff] %v5868_v31  ;;  %6987 = vst [vmem:[#allocation11_spill] sm:$0xff] %v5873_v32  ;;  %v5883_v34 = vld [vmem:[%s6980_s4 + $0x110] sm:$0xff]  ;;  %v5888_v35 = vld [vmem:[%s6980_s4 + $0x118] sm:$0xff] }
   0xe   :  { %v5893_v36 = vld [vmem:[%s6980_s4 + $0x120] sm:$0xff]  ;;  %v5898_v37 = vld [vmem:[%s6980_s4 + $0x128] sm:$0xff]  ;;  %v5903_v38 = vld [vmem:[%s6980_s4 + $0x130] sm:$0xff] }
   0xf   :  { %v5908_v39 = vld [vmem:[%s6980_s4 + $0x138] sm:$0xff]  ;;  %v5913_v40 = vld [vmem:[%s6980_s4 + $0x140] sm:$0xff]  ;;  %v5918_v41 = vld [vmem:[%s6980_s4 + $0x148] sm:$0xff] }
  0x10   :  { %6988 = vst [vmem:[#allocation12_spill] sm:$0xff] %v5908_v39  ;;  %6989 = vst [vmem:[#allocation13_spill] sm:$0xff] %v5913_v40  ;;  %v5923_v42 = vld [vmem:[%s6980_s4 + $0x150] sm:$0xff]  ;;  %v5928_v43 = vld [vmem:[%s6980_s4 + $0x158] sm:$0xff] }
  0x11   :  { %6990 = vst [vmem:[#allocation14_spill] sm:$0xff] %v5918_v41  ;;  %6991 = vst [vmem:[#allocation15_spill] sm:$0xff] %v5923_v42  ;;  %v5933_v44 = vld [vmem:[%s6980_s4 + $0x160] sm:$0xff]  ;;  %v5938_v45 = vld [vmem:[%s6980_s4 + $0x168] sm:$0xff] }
  0x12   :  { %6992 = vst [vmem:[#allocation16_spill] sm:$0xff] %v5928_v43  ;;  %6993 = vst [vmem:[#allocation17_spill] sm:$0xff] %v5933_v44  ;;  %v5943_v46 = vld [vmem:[%s6980_s4 + $0x170] sm:$0xff]  ;;  %v5948_v47 = vld [vmem:[%s6980_s4 + $0x178] sm:$0xff] }
  0x13   :  { %v5953_v48 = vld [vmem:[%s6980_s4 + $0x180] sm:$0xff]  ;;  %v5958_v49 = vld [vmem:[%s6980_s4 + $0x188] sm:$0xff]  ;;  %v5963_v50 = vld [vmem:[%s6980_s4 + $0x190] sm:$0xff] }
  0x14   :  { %6994 = vst [vmem:[#allocation18_spill] sm:$0xff] %v5963_v50  ;;  %v5968_v51 = vld [vmem:[%s6980_s4 + $0x198] sm:$0xff]  ;;  %v5973_v52 = vld [vmem:[%s6980_s4 + $0x1a0] sm:$0xff]  ;;  %v5978_v53 = vld [vmem:[%s6980_s4 + $0x1a8] sm:$0xff] }
  0x15   :  { %6995 = vst [vmem:[#allocation19_spill] sm:$0xff] %v5968_v51  ;;  %6996 = vst [vmem:[#allocation20_spill] sm:$0xff] %v5973_v52  ;;  %v5983_v54 = vld [vmem:[%s6980_s4 + $0x1b0] sm:$0xff]  ;;  %v5988_v55 = vld [vmem:[%s6980_s4 + $0x1b8] sm:$0xff] }
  0x16   :  { %6997 = vst [vmem:[#allocation21_spill] sm:$0xff] %v5978_v53  ;;  %6998 = vst [vmem:[#allocation22_spill] sm:$0xff] %v5983_v54  ;;  %v5993_v56 = vld [vmem:[%s6980_s4 + $0x1c0] sm:$0xff]  ;;  %v5998_v57 = vld [vmem:[%s6980_s4 + $0x1c8] sm:$0xff] }
  0x17   :  { %6999 = vst [vmem:[#allocation23_spill] sm:$0xff] %v5988_v55  ;;  %7000 = vst [vmem:[#allocation24_spill] sm:$0xff] %v5993_v56  ;;  %v6003_v58 = vld [vmem:[%s6980_s4 + $0x1d0] sm:$0xff]  ;;  %v6008_v59 = vld [vmem:[%s6980_s4 + $0x1d8] sm:$0xff] }
  0x18   :  { %7001 = vst [vmem:[#allocation25_spill] sm:$0xff] %v5998_v57  ;;  %7002 = vst [vmem:[#allocation26_spill] sm:$0xff] %v6003_v58  ;;  %v6013_v60 = vld [vmem:[%s6980_s4 + $0x1e0] sm:$0xff]  ;;  %v6018_v61 = vld [vmem:[%s6980_s4 + $0x1e8] sm:$0xff] }
  0x19   :  { %7003 = vst [vmem:[#allocation27_spill] sm:$0xff] %v6008_v59  ;;  %7004 = vst [vmem:[#allocation28_spill] sm:$0xff] %v6013_v60  ;;  %v6023_v62 = vld [vmem:[%s6980_s4 + $0x1f0] sm:$0xff]  ;;  %v6028_v63 = vld [vmem:[%s6980_s4 + $0x1f8] sm:$0xff] }
  0x1a   :  { %7005 = vst [vmem:[#allocation29_spill] sm:$0xff] %v6018_v61  ;;  %7006 = vst [vmem:[#allocation30_spill] sm:$0xff] %v6023_v62  ;;  %v6033_v56 = vld [vmem:[%s6980_s4 + $0x200] sm:$0xff]  ;;  %v6038_v55 = vld [vmem:[%s6980_s4 + $0x208] sm:$0xff] }
  0x1b   :  { %7007 = vst [vmem:[#allocation31_spill] sm:$0xff] %v6028_v63  ;;  %7008 = vst [vmem:[#allocation32_spill] sm:$0xff] %v6033_v56  ;;  %v6043_v54 = vld [vmem:[%s6980_s4 + $0x210] sm:$0xff]  ;;  %v6048_v53 = vld [vmem:[%s6980_s4 + $0x218] sm:$0xff] }
  0x1c   :  { %7009 = vst [vmem:[#allocation33_spill] sm:$0xff] %v6038_v55  ;;  %7010 = vst [vmem:[#allocation34_spill] sm:$0xff] %v6043_v54  ;;  %v6053_v63 = vld [vmem:[%s6980_s4 + $0x220] sm:$0xff]  ;;  %v6058_v56 = vld [vmem:[%s6980_s4 + $0x228] sm:$0xff] }
  0x1d   :  { %7011 = vst [vmem:[#allocation35_spill] sm:$0xff] %v6048_v53  ;;  %7012 = vst [vmem:[#allocation36_spill] sm:$0xff] %v6053_v63  ;;  %v6063_v55 = vld [vmem:[%s6980_s4 + $0x230] sm:$0xff]  ;;  %v6068_v54 = vld [vmem:[%s6980_s4 + $0x238] sm:$0xff] }
  0x1e   :  { %7013 = vst [vmem:[#allocation37_spill] sm:$0xff] %v6058_v56  ;;  %7014 = vst [vmem:[#allocation38_spill] sm:$0xff] %v6063_v55  ;;  %v6073_v53 = vld [vmem:[%s6980_s4 + $0x240] sm:$0xff]  ;;  %v6078_v63 = vld [vmem:[%s6980_s4 + $0x248] sm:$0xff] }
  0x1f   :  { %7015 = vst [vmem:[#allocation39_spill] sm:$0xff] %v6068_v54  ;;  %7016 = vst [vmem:[#allocation40_spill] sm:$0xff] %v6073_v53  ;;  %v6083_v52 = vld [vmem:[%s6980_s4 + $0x250] sm:$0xff]  ;;  %v6088_v51 = vld [vmem:[%s6980_s4 + $0x258] sm:$0xff] }
  0x20   :  { %7017 = vst [vmem:[#allocation41_spill] sm:$0xff] %v6078_v63  ;;  %7018 = vst [vmem:[#allocation42_spill] sm:$0xff] %v6083_v52  ;;  %v6093_v54 = vld [vmem:[%s6980_s4 + $0x260] sm:$0xff]  ;;  %v6098_v53 = vld [vmem:[%s6980_s4 + $0x268] sm:$0xff] }
  0x21   :  { %7019 = vst [vmem:[#allocation43_spill] sm:$0xff] %v6088_v51  ;;  %7020 = vst [vmem:[#allocation44_spill] sm:$0xff] %v6093_v54  ;;  %v6103_v63 = vld [vmem:[%s6980_s4 + $0x270] sm:$0xff]  ;;  %v6108_v52 = vld [vmem:[%s6980_s4 + $0x278] sm:$0xff] }
  0x22   :  { %7021 = vst [vmem:[#allocation45_spill] sm:$0xff] %v6098_v53  ;;  %7022 = vst [vmem:[#allocation46_spill] sm:$0xff] %v6103_v63  ;;  %v6113_v51 = vld [vmem:[%s6980_s4 + $0x280] sm:$0xff]  ;;  %v6118_v54 = vld [vmem:[%s6980_s4 + $0x288] sm:$0xff] }
  0x23   :  { %7023 = vst [vmem:[#allocation47_spill] sm:$0xff] %v6108_v52  ;;  %7024 = vst [vmem:[#allocation48_spill] sm:$0xff] %v6113_v51  ;;  %v6123_v53 = vld [vmem:[%s6980_s4 + $0x290] sm:$0xff]  ;;  %v6128_v63 = vld [vmem:[%s6980_s4 + $0x298] sm:$0xff] }
  0x24   :  { %7025 = vst [vmem:[#allocation49_spill] sm:$0xff] %v6118_v54  ;;  %7026 = vst [vmem:[#allocation50_spill] sm:$0xff] %v6123_v53  ;;  %v6133_v52 = vld [vmem:[%s6980_s4 + $0x2a0] sm:$0xff]  ;;  %v6138_v51 = vld [vmem:[%s6980_s4 + $0x2a8] sm:$0xff] }
  0x25   :  { %7027 = vst [vmem:[#allocation51_spill] sm:$0xff] %v6128_v63  ;;  %7028 = vst [vmem:[#allocation52_spill] sm:$0xff] %v6133_v52  ;;  %v6143_v54 = vld [vmem:[%s6980_s4 + $0x2b0] sm:$0xff]  ;;  %v6148_v53 = vld [vmem:[%s6980_s4 + $0x2b8] sm:$0xff] }
  0x26   :  { %7029 = vst [vmem:[#allocation53_spill] sm:$0xff] %v6138_v51  ;;  %7030 = vst [vmem:[#allocation54_spill] sm:$0xff] %v6143_v54  ;;  %v6153_v63 = vld [vmem:[%s6980_s4 + $0x2c0] sm:$0xff]  ;;  %v6158_v52 = vld [vmem:[%s6980_s4 + $0x2c8] sm:$0xff] }
  0x27   :  { %7031 = vst [vmem:[#allocation55_spill] sm:$0xff] %v6148_v53  ;;  %7032 = vst [vmem:[#allocation56_spill] sm:$0xff] %v6153_v63 }
  0x28   :  { %7033 = vst [vmem:[#allocation57_spill] sm:$0xff] %v6158_v52 }
  0x29   :  { %238 = vsyncadd [#allocation3], 11520  ;;  %v5564_v54 = vld [vmem:[%s6977_s1] sm:$0xff]   ;;  %v5565_v51 = vld [vmem:[%s6977_s1 + $0x8] sm:$0xff]   ;;  %vm304_vm0 = vcmask 523264   ;;  %vm805_vm9 = vcmask 261120  }
  0x2a   :  { %4856 = vmatprep.subr.bf16.mxu0 %v5564_v54  ;;  %v5566_v63 = vld [vmem:[%s6977_s1 + $0x10] sm:$0xff]   ;;  %v5568_v52 = vld [vmem:[%s6976_s0] sm:$0xff]   ;;  %v5567_v53 = vld [vmem:[%s6977_s1 + $0x18] sm:$0xff]   ;;  %vm1881_vm14 = vcmask 392192  }
  0x2b   :  { %4857 = vmatpush3.bf16.msra.mxu0 %v5564_v54  ;;  %4864 = vmatprep.mubr.msk.bf16.mxu0 %vm304_vm0, %v5568_v52  ;;  %v5569_v54 = vld [vmem:[%s6976_s0 + $0x8] sm:$0xff]   ;;  %v5570_v55 = vld [vmem:[%s6976_s0 + $0x10] sm:$0xff]  }
  0x2c   :  { %4858 = vmatprep.subr.bf16.mxu0 %v5565_v51  ;;  %v5572_v52 = vld [vmem:[%s6978_s2 + $0x10] sm:$0xff]  }
  0x2d   :  { %4884 = vmatprep.mubr.msk.bf16.mxu1 %vm304_vm0, %v5572_v52 }
  0x2f   :  { %4859 = vmatpush3.bf16.msra.mxu0 %v5565_v51  ;;  %v5571_v51 = vld [vmem:[%s6976_s0 + $0x18] sm:$0xff]  }
  0x30   :  { %4860 = vmatprep.subr.bf16.mxu0 %v5566_v63 }
  0x33   :  { %4861 = vmatpush3.bf16.msra.mxu0 %v5566_v63 }
  0x34   :  { %4862 = vmatprep.subr.bf16.mxu0 %v5567_v53 }
  0x37   :  { %4863 = vmatpush3.bf16.msra.mxu0 %v5567_v53  ;;  %v5574_v53 = vld [vmem:[%s6978_s2] sm:$0xff]  }
  0x3a   :  { %4865 = vmatmul.mubr.msk.bf16.vlgmr.msra.gmra.mrb[0].mxu0 %vm304_vm0, %v5569_v54 }
  0x3b   :  { %4868 = vmatprep.mubr.msk.bf16.mxu0 %vm304_vm0, %v5570_v55  ;;  %v4340_v55 = vld [vmem:[%s6979_s3] ss:$0 sm:$0xff] }
  0x42   :  { %4869 = vmatmul.mubr.msk.bf16.gmra.mrb[4].mxu0 %vm304_vm0, %v5571_v51 }
  0x43   :  { %4880 = vmatprep.mubr.msk.bf16.mxu0 %vm304_vm0, %v5574_v53 }
 0x10d   :  { %v4866_v63 = vpop.f32.mrb[0].mxu0 }
 0x10e   :  { %v360_v54 = vadd.f32 %v4866_v63, %v4340_v55  ;;  %v351_v44 = vpop.f32.mrb[1].mxu0 }
 0x10f   :  { %v352_v51 = vadd.f32 %v4340_v55, %v351_v44  ;;  %v4867_v56 = vpop.f32.mrb[2].mxu0 }
 0x110   :  { %v392_v43 = vmul.f32 0.01, %v360_v54  ;;  %v363_v62 = vadd.f32 %v4867_v56, %v4340_v55  ;;  %v354_v42 = vpop.f32.mrb[3].mxu0  ;;  %vm384_vm1 = vcmp.ge.f32.partialorder %v360_v54, 0.0 }
 0x111   :  { %v390_v52 = vmul.f32 0.01, %v352_v51  ;;  %v355_v61 = vadd.f32 %v4340_v55, %v354_v42  ;;  %vm382_vm2 = vcmp.ge.f32.partialorder %v352_v51, 0.0 }
 0x112   :  { %vm385_vm3 = vcmp.ge.f32.partialorder %v363_v62, 0.0  ;;  %v393_v41 = vmul.f32 0.01, %v363_v62  ;;  %v400_v60 = vsel %vm384_vm1, %v360_v54, %v392_v43  ;;  %v5577_v54 = vld [vmem:[%s6978_s2 + $0x28] sm:$0xff]  }
 0x113   :  { %vm383_vm4 = vcmp.ge.f32.partialorder %v355_v61, 0.0  ;;  %v391_v53 = vmul.f32 0.01, %v355_v61  ;;  %v398_v59 = vsel %vm382_vm2, %v352_v51, %v390_v52  ;;  %v5578_v51 = vld [vmem:[%s6978_s2 + $0x30] sm:$0xff]   ;;  %v5579_v52 = vld [vmem:[%s6978_s2 + $0x38] sm:$0xff]  }
 0x114   :  { %v401_v40 = vsel %vm385_vm3, %v363_v62, %v393_v41 }
 0x115   :  { %v6199_v39 = vpack.c.bf16 %v401_v40, %v400_v60  ;;  %v399_v63 = vsel %vm383_vm4, %v355_v61, %v391_v53  ;;  %v4870_v58 = vpop.f32.mrb[4].mxu0  ;;  %v5580_v53 = vld [vmem:[%s6978_s2 + $0x40] sm:$0xff]  }
 0x116   :  { %v6201_v44 = vpack.c.bf16 %v399_v63, %v398_v59  ;;  %v376_v32 = vadd.f32 %v4870_v58, %v4340_v55  ;;  %v367_v56 = vpop.f32.mrb[5].mxu0  ;;  %v5581_v63 = vld [vmem:[%s6978_s2 + $0x48] sm:$0xff]  }
 0x117   :  { %v368_v57 = vadd.f32 %v4340_v55, %v367_v56  ;;  %v4871_v31 = vpop.f32.mrb[6].mxu0  ;;  %v5582_v56 = vld [vmem:[%s6978_s2 + $0x50] sm:$0xff]  }
 0x118   :  { %v396_v30 = vmul.f32 0.01, %v376_v32  ;;  %v379_v42 = vadd.f32 %v4871_v31, %v4340_v55  ;;  %v370_v29 = vpop.f32.mrb[7].mxu0  ;;  %4872 = vmatprep.subr.bf16.mxu0 %v6201_v44  ;;  %5490 = vmatprep.subr.bf16.mxu1 %v6201_v44  ;;  %vm388_vm5 = vcmp.ge.f32.partialorder %v376_v32, 0.0 }
 0x119   :  { %v394_v41 = vmul.f32 0.01, %v368_v57  ;;  %v371_v43 = vadd.f32 %v4340_v55, %v370_v29  ;;  %4873 = vmatpush3.bf16.msra.mxu0 %v6201_v44  ;;  %5494 = vmatpush3.bf16.msra.mxu1 %v6201_v44  ;;  %vm386_vm6 = vcmp.ge.f32.partialorder %v368_v57, 0.0  ;;  %v5576_v55 = vld [vmem:[%s6978_s2 + $0x20] sm:$0xff]  }
 0x11a   :  { %vm389_vm7 = vcmp.ge.f32.partialorder %v379_v42, 0.0  ;;  %v397_v40 = vmul.f32 0.01, %v379_v42  ;;  %4874 = vmatprep.subr.bf16.mxu0 %v6199_v39  ;;  %5491 = vmatprep.subr.bf16.mxu1 %v6199_v39  ;;  %v404_v58 = vsel %vm388_vm5, %v376_v32, %v396_v30  ;;  %v5590_v30 = vld [vmem:[%s6977_s1 + $0x30] sm:$0xff]   ;;  %v5573_v32 = vld [vmem:[%s6978_s2 + $0x18] sm:$0xff]  }
 0x11b   :  { %vm387_vm8 = vcmp.ge.f32.partialorder %v371_v43, 0.0  ;;  %v395_v31 = vmul.f32 0.01, %v371_v43  ;;  %v402_v60 = vsel %vm386_vm6, %v368_v57, %v394_v41  ;;  %v5575_v57 = vld [vmem:[%s6978_s2 + $0x8] sm:$0xff]   ;;  %v5584_v41 = vld [vmem:[%s6978_s2 + $0x60] sm:$0xff]  }
 0x11c   :  { %v405_v59 = vsel %vm389_vm7, %v379_v42, %v397_v40  ;;  %v5583_v42 = vld [vmem:[%s6978_s2 + $0x58] sm:$0xff]   ;;  %v5586_v40 = vld [vmem:[%s6978_s2 + $0x70] sm:$0xff]  }
 0x11d   :  { %v6209_v61 = vpack.c.bf16 %v405_v59, %v404_v58  ;;  %v403_v62 = vsel %vm387_vm8, %v371_v43, %v395_v31  ;;  %4875 = vmatpush3.bf16.msra.mxu0 %v6199_v39  ;;  %5495 = vmatpush3.bf16.msra.mxu1 %v6199_v39  ;;  %v5585_v43 = vld [vmem:[%s6978_s2 + $0x68] sm:$0xff]   ;;  %v5587_v31 = vld [vmem:[%s6978_s2 + $0x78] sm:$0xff]   ;;  %v5588_v58 = vld [vmem:[%s6978_s2 + $0x80] sm:$0xff]  }
 0x11e   :  { %v6213_v29 = vpack.c.bf16 %v403_v62, %v402_v60  ;;  %v5589_v59 = vld [vmem:[%s6978_s2 + $0x88] sm:$0xff]   ;;  %v5591_v60 = vld [vmem:[%s6977_s1 + $0x38] sm:$0xff]   ;;  %v5592_v62 = vld [vmem:[%s6977_s1 + $0x20] sm:$0xff]  }
 0x120   :  { %4876 = vmatprep.subr.bf16.mxu0 %v6213_v29  ;;  %5492 = vmatprep.subr.bf16.mxu1 %v6213_v29 }
 0x121   :  { %4877 = vmatpush3.bf16.msra.mxu0 %v6213_v29  ;;  %5496 = vmatpush3.bf16.msra.mxu1 %v6213_v29 }
 0x122   :  { %4878 = vmatprep.subr.bf16.mxu0 %v6209_v61  ;;  %5493 = vmatprep.subr.bf16.mxu1 %v6209_v61 }
 0x125   :  { %4879 = vmatpush3.bf16.msra.mxu0 %v6209_v61  ;;  %5497 = vmatpush3.bf16.msra.mxu1 %v6209_v61 }
 0x126   :  { %4916 = vmatprep.subr.bf16.mxu0 %v5590_v30 }
 0x128   :  { %4885 = vmatmul.mubr.msk.bf16.vlgmr.msra.gmra.mrb[0].mxu1 %vm304_vm0, %v5573_v32  ;;  %4881 = vmatmul.mubr.msk.bf16.vlgmr.msra.gmra.mrb[8].mxu0 %vm304_vm0, %v5575_v57 }
 0x129   :  { %4888 = vmatprep.mubr.msk.bf16.mxu1 %vm304_vm0, %v5576_v55  ;;  %4917 = vmatpush3.bf16.msra.mxu0 %v5590_v30 }
 0x12a   :  { %4918 = vmatprep.subr.bf16.mxu0 %v5591_v60 }
 0x12d   :  { %4919 = vmatpush3.bf16.msra.mxu0 %v5591_v60 }
 0x12e   :  { %4924 = vmatprep.subr.bf16.mxu0 %v5592_v62 }
 0x130   :  { %4889 = vmatmul.mubr.msk.bf16.gmra.mrb[4].mxu1 %vm304_vm0, %v5577_v54 }
 0x131   :  { %4892 = vmatprep.mubr.msk.bf16.mxu1 %vm304_vm0, %v5578_v51 }
 0x138   :  { %4893 = vmatmul.mubr.msk.bf16.gmra.mrb[8].mxu1 %vm304_vm0, %v5579_v52 }
 0x139   :  { %4896 = vmatprep.mubr.msk.bf16.mxu1 %vm304_vm0, %v5580_v53 }
 0x140   :  { %4897 = vmatmul.mubr.msk.bf16.gmra.mrb[12].mxu1 %vm304_vm0, %v5581_v63 }
 0x141   :  { %4900 = vmatprep.mubr.msk.bf16.mxu1 %vm304_vm0, %v5582_v56 }
 0x148   :  { %4901 = vmatmul.mubr.msk.bf16.gmra.mrb[16].mxu1 %vm304_vm0, %v5583_v42 }
 0x149   :  { %4904 = vmatprep.mubr.msk.bf16.mxu1 %vm304_vm0, %v5584_v41 }
 0x150   :  { %4905 = vmatmul.mubr.msk.bf16.gmra.mrb[20].mxu1 %vm304_vm0, %v5585_v43  ;;  %v5593_v43 = vld [vmem:[%s6977_s1 + $0x28] sm:$0xff]  }
 0x151   :  { %4908 = vmatprep.mubr.msk.bf16.mxu1 %vm304_vm0, %v5586_v40 }
 0x158   :  { %4909 = vmatmul.mubr.msk.bf16.gmra.mrb[24].mxu1 %vm304_vm0, %v5587_v31 }
 0x159   :  { %4912 = vmatprep.mubr.msk.bf16.mxu1 %vm304_vm0, %v5588_v58  ;;  %v5594_v58 = vld [vmem:[%s6977_s1 + $0x40] sm:$0xff]  }
 0x160   :  { %4913 = vmatmul.mubr.msk.bf16.gmra.mrb[28].mxu1 %vm304_vm0, %v5589_v59 }
 0x1fb   :  { %v4886_v30 = vpop.f32.mrb[0].mxu1  ;;  %v4882_v32 = vpop.f32.mrb[8].mxu0 }
 0x1fc   :  { %v640_v57 = vpop.f32.mrb[1].mxu1  ;;  %v624_v55 = vpop.f32.mrb[9].mxu0 }
 0x1fd   :  { %v4887_v54 = vpop.f32.mrb[2].mxu1  ;;  %v4883_v51 = vpop.f32.mrb[10].mxu0 }
 0x1fe   :  { %v770_v52 = vpack.c.bf16 %v4887_v54, %v4886_v30  ;;  %v643_v53 = vpop.f32.mrb[3].mxu1  ;;  %v768_v63 = vpack.c.bf16 %v4883_v51, %v4882_v32  ;;  %v627_v56 = vpop.f32.mrb[11].mxu0 }
 0x1ff   :  { %v769_v42 = vpack.c.bf16 %v643_v53, %v640_v57  ;;  %v767_v41 = vpack.c.bf16 %v627_v56, %v624_v55  ;;  %v5596_v56 = vld [vmem:[%s6977_s1 + $0x50] sm:$0xff]  }
 0x201   :  { %4920 = vmatprep.mubr.msk.bf16.mxu0 %vm805_vm9, %v769_v42 }
 0x202   :  { %4921 = vmatmul.mubr.msk.bf16.vlgmr.msra.gmra.mrb[12].mxu0 %vm805_vm9, %v770_v52 }
 0x203   :  { %4925 = vmatpush3.bf16.msra.mxu0 %v5592_v62  ;;  %4928 = vmatprep.mubr.msk.bf16.mxu0 %vm805_vm9, %v767_v41  ;;  %v4890_v40 = vpop.f32.mrb[4].mxu1  ;;  %v5595_v62 = vld [vmem:[%s6977_s1 + $0x48] sm:$0xff]  }
 0x204   :  { %4926 = vmatprep.subr.bf16.mxu0 %v5593_v43  ;;  %v656_v31 = vpop.f32.mrb[5].mxu1 }
 0x205   :  { %v4891_v59 = vpop.f32.mrb[6].mxu1 }
 0x206   :  { %v772_v60 = vpack.c.bf16 %v4891_v59, %v4890_v40  ;;  %v659_v30 = vpop.f32.mrb[7].mxu1 }
 0x207   :  { %4927 = vmatpush3.bf16.msra.mxu0 %v5593_v43  ;;  %v771_v32 = vpack.c.bf16 %v659_v30, %v656_v31  ;;  %v5598_v30 = vld [vmem:[%s6977_s1 + $0x60] sm:$0xff]  }
 0x208   :  { %4932 = vmatprep.subr.bf16.mxu0 %v5594_v58 }
 0x20b   :  { %v4894_v57 = vpop.f32.mrb[8].mxu1 }
 0x20c   :  { %v672_v55 = vpop.f32.mrb[9].mxu1 }
 0x20d   :  { %v4895_v54 = vpop.f32.mrb[10].mxu1 }
 0x20e   :  { %4929 = vmatmul.mubr.msk.bf16.vlgmr.msra.gmra.mrb[12].mxu0 %vm805_vm9, %v768_v63  ;;  %v774_v51 = vpack.c.bf16 %v4895_v54, %v4894_v57  ;;  %v675_v52 = vpop.f32.mrb[11].mxu1  ;;  %v5597_v63 = vld [vmem:[%s6977_s1 + $0x58] sm:$0xff]  }
 0x20f   :  { %4933 = vmatpush3.bf16.msra.mxu0 %v5594_v58  ;;  %4936 = vmatprep.mubr.msk.bf16.mxu0 %vm805_vm9, %v771_v32  ;;  %v773_v53 = vpack.c.bf16 %v675_v52, %v672_v55 }
 0x210   :  { %4934 = vmatprep.subr.bf16.mxu0 %v5595_v62 }
 0x213   :  { %4935 = vmatpush3.bf16.msra.mxu0 %v5595_v62  ;;  %v4898_v42 = vpop.f32.mrb[12].mxu1 }
 0x214   :  { %4940 = vmatprep.subr.bf16.mxu0 %v5596_v56  ;;  %v688_v41 = vpop.f32.mrb[13].mxu1 }
 0x215   :  { %v4899_v43 = vpop.f32.mrb[14].mxu1 }
 0x216   :  { %v776_v40 = vpack.c.bf16 %v4899_v43, %v4898_v42  ;;  %v691_v31 = vpop.f32.mrb[15].mxu1 }
 0x217   :  { %v775_v59 = vpack.c.bf16 %v691_v31, %v688_v41  ;;  %v5600_v31 = vld [vmem:[%s6977_s1 + $0x70] sm:$0xff]  }
 0x21a   :  { %4937 = vmatmul.mubr.msk.bf16.vlgmr.msra.gmra.mrb[12].mxu0 %vm805_vm9, %v772_v60  ;;  %v5599_v60 = vld [vmem:[%s6977_s1 + $0x68] sm:$0xff]  }
 0x21b   :  { %4941 = vmatpush3.bf16.msra.mxu0 %v5596_v56  ;;  %4944 = vmatprep.mubr.msk.bf16.mxu0 %vm805_vm9, %v773_v53  ;;  %v4902_v58 = vpop.f32.mrb[16].mxu1 }
 0x21c   :  { %4942 = vmatprep.subr.bf16.mxu0 %v5597_v63  ;;  %v704_v32 = vpop.f32.mrb[17].mxu1 }
 0x21d   :  { %v4903_v57 = vpop.f32.mrb[18].mxu1 }
 0x21e   :  { %v778_v62 = vpack.c.bf16 %v4903_v57, %v4902_v58  ;;  %v707_v55 = vpop.f32.mrb[19].mxu1 }
 0x21f   :  { %4943 = vmatpush3.bf16.msra.mxu0 %v5597_v63  ;;  %v777_v54 = vpack.c.bf16 %v707_v55, %v704_v32 }
 0x220   :  { %4948 = vmatprep.subr.bf16.mxu0 %v5598_v30 }
 0x223   :  { %v4906_v52 = vpop.f32.mrb[20].mxu1 }
 0x224   :  { %v720_v56 = vpop.f32.mrb[21].mxu1 }
 0x225   :  { %v4907_v53 = vpop.f32.mrb[22].mxu1 }
 0x226   :  { %4945 = vmatmul.mubr.msk.bf16.vlgmr.msra.gmra.mrb[12].mxu0 %vm805_vm9, %v774_v51  ;;  %v780_v42 = vpack.c.bf16 %v4907_v53, %v4906_v52  ;;  %v723_v41 = vpop.f32.mrb[23].mxu1  ;;  %v5601_v51 = vld [vmem:[%s6977_s1 + $0x78] sm:$0xff]  }
 0x227   :  { %4949 = vmatpush3.bf16.msra.mxu0 %v5598_v30  ;;  %4952 = vmatprep.mubr.msk.bf16.mxu0 %vm805_vm9, %v775_v59  ;;  %v779_v43 = vpack.c.bf16 %v723_v41, %v720_v56  ;;  %v5602_v30 = vld [vmem:[%s6977_s1 + $0x80] sm:$0xff]  }
 0x228   :  { %4950 = vmatprep.subr.bf16.mxu0 %v5599_v60 }
 0x22b   :  { %4951 = vmatpush3.bf16.msra.mxu0 %v5599_v60  ;;  %v4910_v63 = vpop.f32.mrb[24].mxu1 }
 0x22c   :  { %4956 = vmatprep.subr.bf16.mxu0 %v5600_v31  ;;  %v736_v58 = vpop.f32.mrb[25].mxu1 }
 0x22d   :  { %v4911_v32 = vpop.f32.mrb[26].mxu1 }
 0x22e   :  { %v782_v57 = vpack.c.bf16 %v4911_v32, %v4910_v63  ;;  %v739_v55 = vpop.f32.mrb[27].mxu1  ;;  %v4425_v63 = vld [vmem:[%s6979_s3 + $0x1] ss:$0 sm:$0xff] }
 0x22f   :  { %v781_v28 = vpack.c.bf16 %v739_v55, %v736_v58 }
 0x232   :  { %4953 = vmatmul.mubr.msk.bf16.vlgmr.msra.gmra.mrb[12].mxu0 %vm805_vm9, %v776_v40  ;;  %v5603_v40 = vld [vmem:[%s6977_s1 + $0x88] sm:$0xff]  }
 0x233   :  { %4957 = vmatpush3.bf16.msra.mxu0 %v5600_v31  ;;  %4960 = vmatprep.mubr.msk.bf16.mxu0 %vm805_vm9, %v777_v54  ;;  %v4914_v59 = vpop.f32.mrb[28].mxu1  ;;  %v5604_v54 = vld [vmem:[%s6977_s1 + $0x90] sm:$0xff]   ;;  %v5605_v31 = vld [vmem:[%s6977_s1 + $0x98] sm:$0xff]  }
 0x234   :  { %4958 = vmatprep.subr.bf16.mxu0 %v5601_v51  ;;  %v752_v52 = vpop.f32.mrb[29].mxu1 }
 0x235   :  { %v4915_v60 = vpop.f32.mrb[30].mxu1 }
 0x236   :  { %v784_v56 = vpack.c.bf16 %v4915_v60, %v4914_v59  ;;  %v755_v53 = vpop.f32.mrb[31].mxu1 }
 0x237   :  { %4959 = vmatpush3.bf16.msra.mxu0 %v5601_v51  ;;  %v783_v41 = vpack.c.bf16 %v755_v53, %v752_v52 }
 0x238   :  { %4964 = vmatprep.subr.bf16.mxu0 %v5602_v30 }
 0x23e   :  { %4961 = vmatmul.mubr.msk.bf16.vlgmr.msra.gmra.mrb[12].mxu0 %vm805_vm9, %v778_v62  ;;  %v5606_v62 = vld [vmem:[%s6977_s1 + $0xa0] sm:$0xff]  }
 0x23f   :  { %4965 = vmatpush3.bf16.msra.mxu0 %v5602_v30  ;;  %4968 = vmatprep.mubr.msk.bf16.mxu0 %vm805_vm9, %v779_v43  ;;  %v5607_v43 = vld [vmem:[%s6977_s1 + $0xa8] sm:$0xff]  }
 0x240   :  { %4966 = vmatprep.subr.bf16.mxu0 %v5603_v40 }
 0x243   :  { %4967 = vmatpush3.bf16.msra.mxu0 %v5603_v40 }
 0x244   :  { %4972 = vmatprep.subr.bf16.mxu0 %v5604_v54 }
 0x24a   :  { %4969 = vmatmul.mubr.msk.bf16.vlgmr.msra.gmra.mrb[12].mxu0 %vm805_vm9, %v780_v42  ;;  %v5628_v42 = vld [vmem:[%s6977_s1 + $0xc8] sm:$0xff]  }
 0x24b   :  { %4973 = vmatpush3.bf16.msra.mxu0 %v5604_v54  ;;  %4976 = vmatprep.mubr.msk.bf16.mxu0 %vm805_vm9, %v781_v28  ;;  %v5608_v28 = vld [vmem:[%s6978_s2 + $0x90] sm:$0xff]  }
 0x24c   :  { %4974 = vmatprep.subr.bf16.mxu0 %v5605_v31  ;;  %4992 = vmatprep.mubr.msk.bf16.mxu1 %vm805_vm9, %v5608_v28 }
 0x24f   :  { %4975 = vmatpush3.bf16.msra.mxu0 %v5605_v31 }
 0x250   :  { %4980 = vmatprep.subr.bf16.mxu0 %v5606_v62 }
 0x256   :  { %4977 = vmatmul.mubr.msk.bf16.vlgmr.msra.gmra.mrb[12].mxu0 %vm805_vm9, %v782_v57 }
 0x257   :  { %4981 = vmatpush3.bf16.msra.mxu0 %v5606_v62  ;;  %4984 = vmatprep.mubr.msk.bf16.mxu0 %vm805_vm9, %v783_v41 }
 0x258   :  { %4982 = vmatprep.subr.bf16.mxu0 %v5607_v43 }
 0x25b   :  { %4983 = vmatpush3.bf16.msra.mxu0 %v5607_v43 }
 0x25c   :  { %5028 = vmatprep.subr.bf16.mxu0 %v5628_v42 }
 0x262   :  { %4985 = vmatmul.mubr.msk.bf16.vlgmr.msra.gmra.mrb[12].mxu0 %vm805_vm9, %v784_v56 }
 0x263   :  { %5029 = vmatpush3.bf16.msra.mxu0 %v5628_v42  ;;  %v5609_v42 = vld [vmem:[%s6978_s2 + $0x98] sm:$0xff]  }
 0x335   :  { %v4986_v58 = vpop.f32.mrb[12].mxu0 }
 0x336   :  { %v1460_v32 = vadd.f32 %v4986_v58, %v4425_v63  ;;  %v1434_v57 = vpop.f32.mrb[13].mxu0  ;;  %v5611_v58 = vld [vmem:[%s6978_s2 + $0xa8] sm:$0xff]  }
 0x337   :  { %v1458_v55 = vadd.f32 %v4425_v63, %v1434_v57  ;;  %v4987_v51 = vpop.f32.mrb[14].mxu0  ;;  %v5616_v57 = vld [vmem:[%s6978_s2 + $0xd0] sm:$0xff]  }
 0x338   :  { %v1468_v59 = vmul.f32 0.01, %v1460_v32  ;;  %v1461_v30 = vadd.f32 %v4987_v51, %v4425_v63  ;;  %v1437_v52 = vpop.f32.mrb[15].mxu0  ;;  %vm1464_vm10 = vcmp.ge.f32.partialorder %v1460_v32, 0.0  ;;  %v5619_v51 = vld [vmem:[%s6978_s2 + $0xe8] sm:$0xff]  }
 0x339   :  { %v1466_v60 = vmul.f32 0.01, %v1458_v55  ;;  %v1459_v56 = vadd.f32 %v4425_v63, %v1437_v52  ;;  %vm1462_vm11 = vcmp.ge.f32.partialorder %v1458_v55, 0.0  ;;  %v5610_v63 = vld [vmem:[%s6978_s2 + $0xa0] sm:$0xff]  }
 0x33a   :  { %vm1465_vm12 = vcmp.ge.f32.partialorder %v1461_v30, 0.0  ;;  %v1469_v53 = vmul.f32 0.01, %v1461_v30  ;;  %v1472_v40 = vsel %vm1464_vm10, %v1460_v32, %v1468_v59  ;;  %v5612_v32 = vld [vmem:[%s6978_s2 + $0xb0] sm:$0xff]   ;;  %v5622_v52 = vld [vmem:[%s6978_s2 + $0x100] sm:$0xff]  }
 0x33b   :  { %vm1463_vm13 = vcmp.ge.f32.partialorder %v1459_v56, 0.0  ;;  %v1467_v41 = vmul.f32 0.01, %v1459_v56  ;;  %v1470_v31 = vsel %vm1462_vm11, %v1458_v55, %v1466_v60  ;;  %v5618_v55 = vld [vmem:[%s6978_s2 + $0xe0] sm:$0xff]   ;;  %v5620_v59 = vld [vmem:[%s6978_s2 + $0xf0] sm:$0xff]   ;;  %v5623_v60 = vld [vmem:[%s6978_s2 + $0x108] sm:$0xff]  }
 0x33c   :  { %v1473_v54 = vsel %vm1465_vm12, %v1461_v30, %v1469_v53  ;;  %v5621_v30 = vld [vmem:[%s6978_s2 + $0xf8] sm:$0xff]  }
 0x33d   :  { %v1471_v62 = vsel %vm1463_vm13, %v1459_v56, %v1467_v41  ;;  %v1475_v43 = vpack.c.bf16 %v1473_v54, %v1472_v40  ;;  %v5624_v56 = vld [vmem:[%s6978_s2 + $0x110] sm:$0xff]   ;;  %v5625_v53 = vld [vmem:[%s6978_s2 + $0x118] sm:$0xff]   ;;  %v5626_v41 = vld [vmem:[%s6978_s2 + $0x120] sm:$0xff]  }
 0x33e   :  { %v1474_v28 = vpack.c.bf16 %v1471_v62, %v1470_v31  ;;  %v5627_v40 = vld [vmem:[%s6978_s2 + $0x128] sm:$0xff]   ;;  %v5629_v54 = vld [vmem:[%s6977_s1 + $0xd0] sm:$0xff]   ;;  %v5630_v31 = vld [vmem:[%s6977_s1 + $0xd8] sm:$0xff]  }
 0x33f   :  { %5030 = vmatprep.subr.bf16.mxu0 %v5629_v54  ;;  %v5631_v62 = vld [vmem:[%s6977_s1 + $0xb0] sm:$0xff]  }
 0x340   :  { %4988 = vmatprep.subr.bf16.mxu1 %v1474_v28  ;;  %5031 = vmatpush3.bf16.msra.mxu0 %v5629_v54 }
 0x341   :  { %4989 = vmatpush3.bf16.msra.mxu1 %v1474_v28  ;;  %5032 = vmatprep.subr.bf16.mxu0 %v5630_v31  ;;  %v5656_v28 = vld [vmem:[%s6977_s1 + $0x190] sm:$0xff]  }
 0x342   :  { %4990 = vmatprep.subr.bf16.mxu1 %v1475_v43 }
 0x344   :  { %5033 = vmatpush3.bf16.msra.mxu0 %v5630_v31  ;;  %v5634_v31 = vld [vmem:[%s6977_s1 + $0xe0] sm:$0xff]  }
 0x345   :  { %4991 = vmatpush3.bf16.msra.mxu1 %v1475_v43  ;;  %5038 = vmatprep.subr.bf16.mxu0 %v5631_v62  ;;  %v5655_v43 = vld [vmem:[%s6977_s1 + $0x188] sm:$0xff]  }
 0x346   :  { %5118 = vmatprep.subr.bf16.mxu1 %v6201_v44 }
 0x348   :  { %4993 = vmatmul.mubr.msk.bf16.vlgmr.msra.gmra.mrb[32].mxu1 %vm805_vm9, %v5609_v42 }
 0x349   :  { %5119 = vmatpush3.bf16.msra.mxu1 %v6201_v44  ;;  %4996 = vmatprep.mubr.msk.bf16.mxu1 %vm805_vm9, %v5610_v63  ;;  %v5613_v44 = vld [vmem:[%s6978_s2 + $0xb8] sm:$0xff]  }
 0x34a   :  { %5120 = vmatprep.subr.bf16.mxu1 %v6199_v39 }
 0x34d   :  { %5121 = vmatpush3.bf16.msra.mxu1 %v6199_v39  ;;  %v5614_v39 = vld [vmem:[%s6978_s2 + $0xc0] sm:$0xff]  }
 0x34e   :  { %5122 = vmatprep.subr.bf16.mxu1 %v6213_v29 }
 0x350   :  { %4997 = vmatmul.mubr.msk.bf16.gmra.mrb[36].mxu1 %vm805_vm9, %v5611_v58 }
 0x351   :  { %5123 = vmatpush3.bf16.msra.mxu1 %v6213_v29  ;;  %5000 = vmatprep.mubr.msk.bf16.mxu1 %vm805_vm9, %v5612_v32  ;;  %v5615_v29 = vld [vmem:[%s6978_s2 + $0xc8] sm:$0xff]  }
 0x352   :  { %5124 = vmatprep.subr.bf16.mxu1 %v6209_v61 }
 0x355   :  { %5125 = vmatpush3.bf16.msra.mxu1 %v6209_v61  ;;  %v5617_v61 = vld [vmem:[%s6978_s2 + $0xd8] sm:$0xff]  }
 0x356   :  { %5130 = vmatprep.subr.bf16.mxu1 %v5655_v43 }
 0x358   :  { %5001 = vmatmul.mubr.msk.bf16.gmra.mrb[40].mxu1 %vm805_vm9, %v5613_v44 }
 0x359   :  { %5004 = vmatprep.mubr.msk.bf16.mxu1 %vm805_vm9, %v5614_v39 }
 0x360   :  { %5005 = vmatmul.mubr.msk.bf16.gmra.mrb[44].mxu1 %vm805_vm9, %v5615_v29 }
 0x361   :  { %5008 = vmatprep.mubr.msk.bf16.mxu1 %vm805_vm9, %v5616_v57 }
 0x368   :  { %5009 = vmatmul.mubr.msk.bf16.gmra.mrb[48].mxu1 %vm805_vm9, %v5617_v61 }
 0x369   :  { %5012 = vmatprep.mubr.msk.bf16.mxu1 %vm805_vm9, %v5618_v55 }
 0x370   :  { %5013 = vmatmul.mubr.msk.bf16.gmra.mrb[52].mxu1 %vm805_vm9, %v5619_v51 }
 0x371   :  { %5016 = vmatprep.mubr.msk.bf16.mxu1 %vm805_vm9, %v5620_v59 }
 0x378   :  { %5017 = vmatmul.mubr.msk.bf16.gmra.mrb[56].mxu1 %vm805_vm9, %v5621_v30  ;;  %v5632_v30 = vld [vmem:[%s6977_s1 + $0xb8] sm:$0xff]  }
 0x379   :  { %5020 = vmatprep.mubr.msk.bf16.mxu1 %vm805_vm9, %v5622_v52 }
 0x380   :  { %5021 = vmatmul.mubr.msk.bf16.gmra.mrb[60].mxu1 %vm805_vm9, %v5623_v60  ;;  %v5633_v60 = vld [vmem:[%s6977_s1 + $0xc0] sm:$0xff]  }
 0x381   :  { %5024 = vmatprep.mubr.msk.bf16.mxu1 %vm805_vm9, %v5624_v56 }
 0x388   :  { %5025 = vmatmul.mubr.msk.bf16.gmra.mrb[64].mxu1 %vm805_vm9, %v5625_v53 }
 0x389   :  { %5126 = vmatprep.mubr.msk.bf16.mxu1 %vm304_vm0, %v5626_v41 }
 0x390   :  { %5127 = vmatmul.mubr.msk.bf16.vlgmr.msra.gmra.mrb[68].mxu1 %vm304_vm0, %v5627_v40 }
 0x391   :  { %5131 = vmatpush3.bf16.msra.mxu1 %v5655_v43  ;;  %v5635_v43 = vld [vmem:[%s6977_s1 + $0xe8] sm:$0xff]  }
 0x392   :  { %5132 = vmatprep.subr.bf16.mxu1 %v5656_v28 }
 0x395   :  { %5133 = vmatpush3.bf16.msra.mxu1 %v5656_v28 }
 0x41b   :  { %v4994_v42 = vpop.f32.mrb[32].mxu1 }
 0x41c   :  { %v1690_v63 = vpop.f32.mrb[33].mxu1 }
 0x41d   :  { %v4995_v58 = vpop.f32.mrb[34].mxu1 }
 0x41e   :  { %v1834_v32 = vpack.c.bf16 %v4995_v58, %v4994_v42  ;;  %v1693_v44 = vpop.f32.mrb[35].mxu1 }
 0x41f   :  { %v1833_v39 = vpack.c.bf16 %v1693_v44, %v1690_v63 }
 0x423   :  { %v4998_v29 = vpop.f32.mrb[36].mxu1 }
 0x424   :  { %v1706_v57 = vpop.f32.mrb[37].mxu1 }
 0x425   :  { %v4999_v61 = vpop.f32.mrb[38].mxu1 }
 0x426   :  { %v1836_v55 = vpack.c.bf16 %v4999_v61, %v4998_v29  ;;  %v1709_v51 = vpop.f32.mrb[39].mxu1 }
 0x427   :  { %v1835_v59 = vpack.c.bf16 %v1709_v51, %v1706_v57  ;;  %v5637_v57 = vld [vmem:[%s6977_s1 + $0xf8] sm:$0xff]  }
 0x429   :  { %5034 = vmatprep.mubr.msk.bf16.mxu0 %vm1881_vm14, %v1835_v59 }
 0x42a   :  { %5035 = vmatmul.mubr.msk.bf16.vlgmr.msra.gmra.mrb[16].mxu0 %vm1881_vm14, %v1836_v55 }
 0x42b   :  { %5039 = vmatpush3.bf16.msra.mxu0 %v5631_v62  ;;  %5044 = vmatprep.mubr.msk.bf16.mxu0 %vm1881_vm14, %v1833_v39  ;;  %v5002_v52 = vpop.f32.mrb[40].mxu1  ;;  %v5636_v39 = vld [vmem:[%s6977_s1 + $0xf0] sm:$0xff]  }
 0x42c   :  { %5040 = vmatprep.subr.bf16.mxu0 %v5632_v30  ;;  %v1722_v56 = vpop.f32.mrb[41].mxu1 }
 0x42d   :  { %v5003_v53 = vpop.f32.mrb[42].mxu1 }
 0x42e   :  { %v1838_v41 = vpack.c.bf16 %v5003_v53, %v5002_v52  ;;  %v1725_v40 = vpop.f32.mrb[43].mxu1 }
 0x42f   :  { %5041 = vmatpush3.bf16.msra.mxu0 %v5632_v30  ;;  %v1837_v54 = vpack.c.bf16 %v1725_v40, %v1722_v56  ;;  %v5638_v30 = vld [vmem:[%s6977_s1 + $0x100] sm:$0xff]  }
 0x430   :  { %5042 = vmatprep.subr.bf16.mxu0 %v5633_v60 }
 0x433   :  { %5043 = vmatpush3.bf16.msra.mxu0 %v5633_v60  ;;  %v5006_v62 = vpop.f32.mrb[44].mxu1  ;;  %v5639_v60 = vld [vmem:[%s6977_s1 + $0x108] sm:$0xff]  }
 0x434   :  { %5048 = vmatprep.subr.bf16.mxu0 %v5634_v31  ;;  %v1738_v28 = vpop.f32.mrb[45].mxu1 }
 0x435   :  { %v5007_v42 = vpop.f32.mrb[46].mxu1 }
 0x436   :  { %5045 = vmatmul.mubr.msk.bf16.vlgmr.msra.gmra.mrb[16].mxu0 %vm1881_vm14, %v1834_v32  ;;  %v1840_v63 = vpack.c.bf16 %v5007_v42, %v5006_v62  ;;  %v1741_v58 = vpop.f32.mrb[47].mxu1 }
 0x437   :  { %5049 = vmatpush3.bf16.msra.mxu0 %v5634_v31  ;;  %5054 = vmatprep.mubr.msk.bf16.mxu0 %vm1881_vm14, %v1837_v54  ;;  %v1839_v44 = vpack.c.bf16 %v1741_v58, %v1738_v28 }
 0x438   :  { %5050 = vmatprep.subr.bf16.mxu0 %v5635_v43 }
 0x43b   :  { %5051 = vmatpush3.bf16.msra.mxu0 %v5635_v43  ;;  %v5010_v29 = vpop.f32.mrb[48].mxu1  ;;  %v5641_v43 = vld [vmem:[%s6977_s1 + $0x118] sm:$0xff]  }
 0x43c   :  { %5052 = vmatprep.subr.bf16.mxu0 %v5636_v39  ;;  %v1754_v61 = vpop.f32.mrb[49].mxu1 }
 0x43d   :  { %v5011_v32 = vpop.f32.mrb[50].mxu1 }
 0x43e   :  { %v1842_v55 = vpack.c.bf16 %v5011_v32, %v5010_v29  ;;  %v1757_v51 = vpop.f32.mrb[51].mxu1  ;;  %v5642_v29 = vld [vmem:[%s6977_s1 + $0x120] sm:$0xff]  }
 0x43f   :  { %5053 = vmatpush3.bf16.msra.mxu0 %v5636_v39  ;;  %v1841_v59 = vpack.c.bf16 %v1757_v51, %v1754_v61  ;;  %v5643_v61 = vld [vmem:[%s6977_s1 + $0x128] sm:$0xff]  }
 0x440   :  { %5058 = vmatprep.subr.bf16.mxu0 %v5637_v57 }
 0x442   :  { %5055 = vmatmul.mubr.msk.bf16.vlgmr.msra.gmra.mrb[16].mxu0 %vm1881_vm14, %v1838_v41  ;;  %v5640_v41 = vld [vmem:[%s6977_s1 + $0x110] sm:$0xff]  }
 0x443   :  { %5059 = vmatpush3.bf16.msra.mxu0 %v5637_v57  ;;  %5064 = vmatprep.mubr.msk.bf16.mxu0 %vm1881_vm14, %v1839_v44  ;;  %v5014_v52 = vpop.f32.mrb[52].mxu1 }
 0x444   :  { %5060 = vmatprep.subr.bf16.mxu0 %v5638_v30  ;;  %v1770_v56 = vpop.f32.mrb[53].mxu1 }
 0x445   :  { %v5015_v53 = vpop.f32.mrb[54].mxu1 }
 0x446   :  { %v1844_v40 = vpack.c.bf16 %v5015_v53, %v5014_v52  ;;  %v1773_v54 = vpop.f32.mrb[55].mxu1 }
 0x447   :  { %5061 = vmatpush3.bf16.msra.mxu0 %v5638_v30  ;;  %v1843_v31 = vpack.c.bf16 %v1773_v54, %v1770_v56  ;;  %v5645_v56 = vld [vmem:[%s6977_s1 + $0x138] sm:$0xff]  }
 0x448   :  { %5062 = vmatprep.subr.bf16.mxu0 %v5639_v60 }
 0x44b   :  { %5063 = vmatpush3.bf16.msra.mxu0 %v5639_v60  ;;  %v5018_v62 = vpop.f32.mrb[56].mxu1 }
 0x44c   :  { %5068 = vmatprep.subr.bf16.mxu0 %v5640_v41  ;;  %v1786_v28 = vpop.f32.mrb[57].mxu1 }
 0x44d   :  { %v5019_v42 = vpop.f32.mrb[58].mxu1 }
 0x44e   :  { %5065 = vmatmul.mubr.msk.bf16.vlgmr.msra.gmra.mrb[16].mxu0 %vm1881_vm14, %v1840_v63  ;;  %v1846_v58 = vpack.c.bf16 %v5019_v42, %v5018_v62  ;;  %v1789_v44 = vpop.f32.mrb[59].mxu1 }
 0x44f   :  { %5069 = vmatpush3.bf16.msra.mxu0 %v5640_v41  ;;  %5074 = vmatprep.mubr.msk.bf16.mxu0 %vm1881_vm14, %v1841_v59  ;;  %v1845_v39 = vpack.c.bf16 %v1789_v44, %v1786_v28  ;;  %v5644_v59 = vld [vmem:[%s6977_s1 + $0x130] sm:$0xff]  }
 0x450   :  { %5070 = vmatprep.subr.bf16.mxu0 %v5641_v43 }
 0x453   :  { %5071 = vmatpush3.bf16.msra.mxu0 %v5641_v43  ;;  %v5022_v57 = vpop.f32.mrb[60].mxu1 }
 0x454   :  { %5072 = vmatprep.subr.bf16.mxu0 %v5642_v29  ;;  %v1802_v32 = vpop.f32.mrb[61].mxu1 }
 0x455   :  { %v5023_v63 = vpop.f32.mrb[62].mxu1 }
 0x456   :  { %v1848_v51 = vpack.c.bf16 %v5023_v63, %v5022_v57  ;;  %v1805_v30 = vpop.f32.mrb[63].mxu1  ;;  %v5651_v63 = vld [vmem:[%s6977_s1 + $0x168] sm:$0xff]  }
 0x457   :  { %5073 = vmatpush3.bf16.msra.mxu0 %v5642_v29  ;;  %v1847_v52 = vpack.c.bf16 %v1805_v30, %v1802_v32  ;;  %v5648_v32 = vld [vmem:[%s6977_s1 + $0x150] sm:$0xff]  }
 0x458   :  { %5078 = vmatprep.subr.bf16.mxu0 %v5643_v61  ;;  %v5652_v30 = vld [vmem:[%s6977_s1 + $0x170] sm:$0xff]  }
 0x45a   :  { %5075 = vmatmul.mubr.msk.bf16.vlgmr.msra.gmra.mrb[16].mxu0 %vm1881_vm14, %v1842_v55  ;;  %v5646_v55 = vld [vmem:[%s6977_s1 + $0x140] sm:$0xff]  }
 0x45b   :  { %5079 = vmatpush3.bf16.msra.mxu0 %v5643_v61  ;;  %5084 = vmatprep.mubr.msk.bf16.mxu0 %vm1881_vm14, %v1843_v31  ;;  %v5026_v60 = vpop.f32.mrb[64].mxu1  ;;  %v5647_v31 = vld [vmem:[%s6977_s1 + $0x148] sm:$0xff]  }
 0x45c   :  { %5080 = vmatprep.subr.bf16.mxu0 %v5644_v59  ;;  %v1818_v53 = vpop.f32.mrb[65].mxu1 }
 0x45d   :  { %v5027_v54 = vpop.f32.mrb[66].mxu1 }
 0x45e   :  { %v1850_v41 = vpack.c.bf16 %v5027_v54, %v5026_v60  ;;  %v1821_v62 = vpop.f32.mrb[67].mxu1 }
 0x45f   :  { %5081 = vmatpush3.bf16.msra.mxu0 %v5644_v59  ;;  %v1849_v43 = vpack.c.bf16 %v1821_v62, %v1818_v53 }
 0x460   :  { %5082 = vmatprep.subr.bf16.mxu0 %v5645_v56 }
 0x463   :  { %5083 = vmatpush3.bf16.msra.mxu0 %v5645_v56  ;;  %v5128_v28 = vpop.f32.mrb[68].mxu1 }
 0x464   :  { %5088 = vmatprep.subr.bf16.mxu0 %v5646_v55  ;;  %v2666_v42 = vpop.f32.mrb[69].mxu1 }
 0x465   :  { %v5129_v44 = vpop.f32.mrb[70].mxu1 }
 0x466   :  { %5085 = vmatmul.mubr.msk.bf16.vlgmr.msra.gmra.mrb[16].mxu0 %vm1881_vm14, %v1844_v40  ;;  %v2682_v29 = vpack.c.bf16 %v5129_v44, %v5128_v28  ;;  %v2669_v57 = vpop.f32.mrb[71].mxu1  ;;  %v5649_v40 = vld [vmem:[%s6977_s1 + $0x158] sm:$0xff]  }
 0x467   :  { %5089 = vmatpush3.bf16.msra.mxu0 %v5646_v55  ;;  %5094 = vmatprep.mubr.msk.bf16.mxu0 %vm1881_vm14, %v1845_v39  ;;  %v2681_v61 = vpack.c.bf16 %v2669_v57, %v2666_v42  ;;  %v5650_v39 = vld [vmem:[%s6977_s1 + $0x160] sm:$0xff]  }
 0x468   :  { %5090 = vmatprep.subr.bf16.mxu0 %v5647_v31 }
 0x469   :  { %5134 = vmatprep.mubr.msk.bf16.mxu1 %vm805_vm9, %v2681_v61 }
 0x46a   :  { %5135 = vmatmul.mubr.msk.bf16.vlgmr.msra.gmra.mrb[72].mxu1 %vm805_vm9, %v2682_v29 }
 0x46b   :  { %5091 = vmatpush3.bf16.msra.mxu0 %v5647_v31 }
 0x46c   :  { %5092 = vmatprep.subr.bf16.mxu0 %v5648_v32 }
 0x46f   :  { %5093 = vmatpush3.bf16.msra.mxu0 %v5648_v32 }
 0x470   :  { %5098 = vmatprep.subr.bf16.mxu0 %v5649_v40 }
 0x472   :  { %5095 = vmatmul.mubr.msk.bf16.vlgmr.msra.gmra.mrb[16].mxu0 %vm1881_vm14, %v1846_v58  ;;  %v5653_v58 = vld [vmem:[%s6977_s1 + $0x178] sm:$0xff]  }
 0x473   :  { %5099 = vmatpush3.bf16.msra.mxu0 %v5649_v40  ;;  %5104 = vmatprep.mubr.msk.bf16.mxu0 %vm1881_vm14, %v1847_v52  ;;  %v5654_v52 = vld [vmem:[%s6977_s1 + $0x180] sm:$0xff]  }
 0x474   :  { %5100 = vmatprep.subr.bf16.mxu0 %v5650_v39 }
 0x477   :  { %5101 = vmatpush3.bf16.msra.mxu0 %v5650_v39 }
 0x478   :  { %5102 = vmatprep.subr.bf16.mxu0 %v5651_v63 }
 0x47b   :  { %5103 = vmatpush3.bf16.msra.mxu0 %v5651_v63 }
 0x47c   :  { %5108 = vmatprep.subr.bf16.mxu0 %v5652_v30 }
 0x47e   :  { %5105 = vmatmul.mubr.msk.bf16.vlgmr.msra.gmra.mrb[16].mxu0 %vm1881_vm14, %v1848_v51  ;;  %v4507_v51 = vld [vmem:[%s6979_s3 + $0x2] ss:$0 sm:$0xff] }
 0x47f   :  { %5109 = vmatpush3.bf16.msra.mxu0 %v5652_v30  ;;  %5114 = vmatprep.mubr.msk.bf16.mxu0 %vm1881_vm14, %v1849_v43 }
 0x480   :  { %5110 = vmatprep.subr.bf16.mxu0 %v5653_v58 }
 0x483   :  { %5111 = vmatpush3.bf16.msra.mxu0 %v5653_v58 }
 0x484   :  { %5112 = vmatprep.subr.bf16.mxu0 %v5654_v52 }
 0x487   :  { %5113 = vmatpush3.bf16.msra.mxu0 %v5654_v52 }
 0x48a   :  { %5115 = vmatmul.mubr.msk.bf16.vlgmr.msra.gmra.mrb[16].mxu0 %vm1881_vm14, %v1850_v41 }
 0x53d   :  { %v5136_v59 = vpop.f32.mrb[72].mxu1 }
 0x53e   :  { %v2739_v60 = vpop.f32.mrb[73].mxu1 }
 0x53f   :  { %v5137_v56 = vpop.f32.mrb[74].mxu1 }
 0x540   :  { %v2742_v53 = vpop.f32.mrb[75].mxu1 }
 0x55d   :  { %v5116_v54 = vpop.f32.mrb[16].mxu0 }
 0x55e   :  { %v2598_v62 = vadd.f32 %v5116_v54, %v4507_v51  ;;  %v2572_v43 = vpop.f32.mrb[17].mxu0 }
 0x55f   :  { %v2596_v55 = vadd.f32 %v4507_v51, %v2572_v43  ;;  %v5117_v28 = vpop.f32.mrb[18].mxu0 }
 0x560   :  { %v2606_v31 = vmul.f32 0.01, %v2598_v62  ;;  %v2599_v42 = vadd.f32 %v5117_v28, %v4507_v51  ;;  %v2575_v44 = vpop.f32.mrb[19].mxu0  ;;  %vm2602_vm15 = vcmp.ge.f32.partialorder %v2598_v62, 0.0 }
 0x561   :  { %v2604_v29 = vmul.f32 0.01, %v2596_v55  ;;  %v2597_v57 = vadd.f32 %v4507_v51, %v2575_v44  ;;  %vm2600_vm0 = vcmp.ge.f32.partialorder %v2596_v55, 0.0 }
 0x562   :  { %v2607_v41 = vmul.f32 0.01, %v2599_v42  ;;  %v2610_v61 = vsel %vm2602_vm15, %v2598_v62, %v2606_v31  ;;  %vm2603_vm1 = vcmp.ge.f32.partialorder %v2599_v42, 0.0 }
 0x563   :  { %v2605_v32 = vmul.f32 0.01, %v2597_v57  ;;  %v2756_v40 = vadd.f32 %v5136_v59, %v2610_v61  ;;  %v2608_v39 = vsel %vm2600_vm0, %v2596_v55, %v2604_v29  ;;  %vm2601_vm2 = vcmp.ge.f32.partialorder %v2597_v57, 0.0 }
 0x564   :  { %v2754_v63 = vadd.f32 %v2739_v60, %v2608_v39  ;;  %v2611_v30 = vsel %vm2603_vm1, %v2599_v42, %v2607_v41 }
 0x565   :  { %v2764_v58 = vmul.f32 0.01, %v2756_v40  ;;  %v2757_v52 = vadd.f32 %v5137_v56, %v2611_v30  ;;  %v2609_v54 = vsel %vm2601_vm2, %v2597_v57, %v2605_v32  ;;  %vm2760_vm3 = vcmp.ge.f32.partialorder %v2756_v40, 0.0 }
 0x566   :  { %v2762_v43 = vmul.f32 0.01, %v2754_v63  ;;  %v2755_v28 = vadd.f32 %v2742_v53, %v2609_v54  ;;  %vm2758_vm4 = vcmp.ge.f32.partialorder %v2754_v63, 0.0 }
 0x567   :  { %vm2761_vm5 = vcmp.ge.f32.partialorder %v2757_v52, 0.0  ;;  %v2765_v27 = vmul.f32 0.01, %v2757_v52  ;;  %v2768_v44 = vsel %vm2760_vm3, %v2756_v40, %v2764_v58 }
 0x568   :  { %vm2759_vm6 = vcmp.ge.f32.partialorder %v2755_v28, 0.0  ;;  %v2763_v51 = vmul.f32 0.01, %v2755_v28  ;;  %v2766_v31 = vsel %vm2758_vm4, %v2754_v63, %v2762_v43 }
 0x569   :  { %v2769_v62 = vsel %vm2761_vm5, %v2757_v52, %v2765_v27 }
 0x56a   :  { %v6560_v50 = vpack.c.bf16 %v2769_v62, %v2768_v44  ;;  %v2767_v59 = vsel %vm2759_vm6, %v2755_v28, %v2763_v51 }
 0x56b   :  { %v6562_v55 = vpack.c.bf16 %v2767_v59, %v2766_v31 }
 0x56c   :  { %5676 = dma.done.wait [#allocation3], 11520 }
 0x56d   :  { %5677 = vsyncadd [#allocation3], 4294955776  ;;  %v5678_v60 = vmov 0.0   ;;  %vm5679_vm7 = vmmov 0   ;;  %v5657_v27 = vld [vmem:[%s6978_s2 + $0x130] sm:$0xff]   ;;  %v5664_v56 = vld [vmem:[%s6978_s2 + $0x168] sm:$0xff]  }
 0x56e   :  { %5138 = vmatprep.subr.bf16.mxu1 %v5678_v60  ;;  %5142 = vmatprep.mubr.msk.bf16.mxu1 %vm5679_vm7, %v5678_v60  ;;  %v5665_v53 = vld [vmem:[%s6978_s2 + $0x170] sm:$0xff]   ;;  %vm3494_vm11 = vcmask 130048   ;;  %vm3648_vm12 = vcmask 785408  }
 0x56f   :  { %5139 = vmatpush3.bf16.msra.mxu1 %v6562_v55  ;;  %5178 = vmatprep.subr.bf16.mxu0 %v5678_v60 }
 0x570   :  { %5140 = vmatprep.subr.bf16.mxu1 %v5678_v60  ;;  %5179 = vmatpush3.bf16.msra.mxu0 %v5728_v3  ;;  %v5658_v3 = vld [vmem:[%s6978_s2 + $0x138] sm:$0xff]  }
 0x571   :  { %5180 = vmatprep.subr.bf16.mxu0 %v5678_v60  ;;  %5184 = vmatprep.mubr.msk.bf16.mxu0 %vm5679_vm7, %v5678_v60 }
 0x573   :  { %5141 = vmatpush3.bf16.msra.mxu1 %v6560_v50 }
 0x574   :  { %5208 = vmatprep.subr.bf16.mxu1 %v5678_v60  ;;  %5181 = vmatpush3.bf16.msra.mxu0 %v5733_v4  ;;  %v5659_v4 = vld [vmem:[%s6978_s2 + $0x140] sm:$0xff]  }
 0x575   :  { %5182 = vmatprep.subr.bf16.mxu0 %v5678_v60 }
 0x576   :  { %5143 = vmatmul.mubr.msk.bf16.vlgmr.msra.gmra.mrb[76].mxu1 %vm805_vm9, %v5657_v27 }
 0x577   :  { %5146 = vmatprep.mubr.msk.bf16.mxu1 %vm5679_vm7, %v5678_v60  ;;  %5209 = vmatpush3.bf16.msra.mxu1 %v5758_v9  ;;  %v5661_v9 = vld [vmem:[%s6978_s2 + $0x150] sm:$0xff]  }
 0x578   :  { %5210 = vmatprep.subr.bf16.mxu1 %v5678_v60  ;;  %5183 = vmatpush3.bf16.msra.mxu0 %v5738_v5  ;;  %v5660_v5 = vld [vmem:[%s6978_s2 + $0x148] sm:$0xff]  }
 0x579   :  { %5188 = vmatprep.subr.bf16.mxu0 %v5678_v60 }
 0x57b   :  { %5211 = vmatpush3.bf16.msra.mxu1 %v5763_v10  ;;  %v5662_v10 = vld [vmem:[%s6978_s2 + $0x158] sm:$0xff]  }
 0x57c   :  { %5212 = vmatprep.subr.bf16.mxu1 %v5678_v60 }
 0x57e   :  { %5147 = vmatmul.mubr.msk.bf16.gmra.mrb[80].mxu1 %vm805_vm9, %v5658_v3 }
 0x57f   :  { %5150 = vmatprep.mubr.msk.bf16.mxu1 %vm5679_vm7, %v5678_v60  ;;  %5213 = vmatpush3.bf16.msra.mxu1 %v5768_v11  ;;  %v5663_v11 = vld [vmem:[%s6978_s2 + $0x160] sm:$0xff]  }
 0x580   :  { %5228 = vmatprep.subr.bf16.mxu1 %v5678_v60 }
 0x586   :  { %5151 = vmatmul.mubr.msk.bf16.gmra.mrb[84].mxu1 %vm805_vm9, %v5659_v4 }
 0x587   :  { %5154 = vmatprep.mubr.msk.bf16.mxu1 %vm5679_vm7, %v5678_v60 }
 0x58e   :  { %5155 = vmatmul.mubr.msk.bf16.gmra.mrb[88].mxu1 %vm805_vm9, %v5660_v5 }
 0x58f   :  { %5158 = vmatprep.mubr.msk.bf16.mxu1 %vm5679_vm7, %v5678_v60 }
 0x596   :  { %5159 = vmatmul.mubr.msk.bf16.gmra.mrb[92].mxu1 %vm805_vm9, %v5661_v9 }
 0x597   :  { %5162 = vmatprep.mubr.msk.bf16.mxu1 %vm5679_vm7, %v5678_v60 }
 0x59e   :  { %5163 = vmatmul.mubr.msk.bf16.gmra.mrb[96].mxu1 %vm805_vm9, %v5662_v10 }
 0x59f   :  { %5166 = vmatprep.mubr.msk.bf16.mxu1 %vm5679_vm7, %v5678_v60 }
 0x5a6   :  { %5167 = vmatmul.mubr.msk.bf16.gmra.mrb[100].mxu1 %vm805_vm9, %v5663_v11 }
 0x5a7   :  { %5170 = vmatprep.mubr.msk.bf16.mxu1 %vm5679_vm7, %v5678_v60 }
 0x5ae   :  { %5171 = vmatmul.mubr.msk.bf16.gmra.mrb[104].mxu1 %vm805_vm9, %v5664_v56 }
 0x5af   :  { %5174 = vmatprep.mubr.msk.bf16.mxu1 %vm5679_vm7, %v5678_v60 }
 0x5b6   :  { %5175 = vmatmul.mubr.msk.bf16.gmra.mrb[108].mxu1 %vm805_vm9, %v5665_v53 }
 0x5b7   :  { %5214 = vmatprep.mubr.msk.bf16.mxu1 %vm5679_vm7, %v5678_v60 }
 0x649   :  { %v2900_v42 = vpop.f32.mrb[76].mxu1 }
 0x64a   :  { %v5144_v29 = vpop.f32.mrb[77].mxu1 }
 0x64b   :  { %v2903_v57 = vpop.f32.mrb[78].mxu1 }
 0x64c   :  { %v2971_v41 = vpack.c.bf16 %v2903_v57, %v2900_v42  ;;  %v5145_v61 = vpop.f32.mrb[79].mxu1 }
 0x651   :  { %v2908_v32 = vpop.f32.mrb[80].mxu1 }
 0x652   :  { %v5148_v40 = vpop.f32.mrb[81].mxu1 }
 0x653   :  { %v2911_v39 = vpop.f32.mrb[82].mxu1 }
 0x654   :  { %v2972_v63 = vpack.c.bf16 %v2911_v39, %v2908_v32  ;;  %v5149_v30 = vpop.f32.mrb[83].mxu1 }
 0x656   :  { %5185 = vmatmul.mubr.msk.bf16.vlgmr.msra.gmra.mrb[20].mxu0 %vm1881_vm14, %v2972_v63 }
 0x657   :  { %5189 = vmatpush3.bf16.msra.mxu0 %v5713_v0  ;;  %5194 = vmatprep.mubr.msk.bf16.mxu0 %vm5679_vm7, %v5678_v60 }
 0x658   :  { %5190 = vmatprep.subr.bf16.mxu0 %v5678_v60 }
 0x659   :  { %v2916_v58 = vpop.f32.mrb[84].mxu1 }
 0x65a   :  { %v5152_v52 = vpop.f32.mrb[85].mxu1 }
 0x65b   :  { %5191 = vmatpush3.bf16.msra.mxu0 %v5718_v1  ;;  %v2919_v54 = vpop.f32.mrb[86].mxu1 }
 0x65c   :  { %v2973_v43 = vpack.c.bf16 %v2919_v54, %v2916_v58  ;;  %v5153_v28 = vpop.f32.mrb[87].mxu1  ;;  %5192 = vmatprep.subr.bf16.mxu0 %v5678_v60 }
 0x65f   :  { %5193 = vmatpush3.bf16.msra.mxu0 %v5723_v2 }
 0x660   :  { %5198 = vmatprep.subr.bf16.mxu0 %v5678_v60 }
 0x661   :  { %v2924_v51 = vpop.f32.mrb[88].mxu1 }
 0x662   :  { %5195 = vmatmul.mubr.msk.bf16.vlgmr.msra.gmra.mrb[24].mxu0 %vm1881_vm14, %v2971_v41  ;;  %v5156_v0 = vpop.f32.mrb[89].mxu1 }
 0x663   :  { %5199 = vmatpush3.bf16.msra.mxu0 %v5743_v6  ;;  %v2927_v44 = vpop.f32.mrb[90].mxu1  ;;  %5204 = vmatprep.mubr.msk.bf16.mxu0 %vm5679_vm7, %v5678_v60 }
 0x664   :  { %v2974_v1 = vpack.c.bf16 %v2927_v44, %v2924_v51  ;;  %v5157_v62 = vpop.f32.mrb[91].mxu1  ;;  %5200 = vmatprep.subr.bf16.mxu0 %v5678_v60 }
 0x666   :  { %5215 = vmatmul.mubr.msk.bf16.vlgmr.msra.gmra.mrb[112].mxu1 %vm1881_vm14, %v2974_v1 }
 0x667   :  { %5201 = vmatpush3.bf16.msra.mxu0 %v5748_v7  ;;  %5229 = vmatpush3.bf16.msra.mxu1 %v5788_v15 }
 0x668   :  { %5202 = vmatprep.subr.bf16.mxu0 %v5678_v60  ;;  %5230 = vmatprep.subr.bf16.mxu1 %v5678_v60 }
 0x669   :  { %v2932_v2 = vpop.f32.mrb[92].mxu1  ;;  %5234 = vmatprep.mubr.msk.bf16.mxu1 %vm5679_vm7, %v5678_v60 }
 0x66a   :  { %v5160_v6 = vpop.f32.mrb[93].mxu1 }
 0x66b   :  { %5203 = vmatpush3.bf16.msra.mxu0 %v5753_v8  ;;  %v2935_v31 = vpop.f32.mrb[94].mxu1  ;;  %5231 = vmatpush3.bf16.msra.mxu1 %v5793_v16 }
 0x66c   :  { %v2975_v59 = vpack.c.bf16 %v2935_v31, %v2932_v2  ;;  %v5161_v27 = vpop.f32.mrb[95].mxu1  ;;  %5218 = vmatprep.subr.bf16.mxu0 %v5678_v60  ;;  %5232 = vmatprep.subr.bf16.mxu1 %v5678_v60 }
 0x66e   :  { %5205 = vmatmul.mubr.msk.bf16.vlgmr.msra.gmra.mrb[28].mxu0 %vm1881_vm14, %v2973_v43 }
 0x66f   :  { %5219 = vmatpush3.bf16.msra.mxu0 %v5773_v12  ;;  %5233 = vmatpush3.bf16.msra.mxu1 %v5798_v17 }
 0x670   :  { %5220 = vmatprep.subr.bf16.mxu0 %v5678_v60  ;;  %5224 = vmatprep.mubr.msk.bf16.mxu0 %vm5679_vm7, %v5678_v60 }
 0x671   :  { %v2940_v7 = vpop.f32.mrb[96].mxu1  ;;  %5248 = vmatprep.subr.bf16.mxu1 %v5678_v60 }
 0x672   :  { %v5164_v8 = vpop.f32.mrb[97].mxu1 }
 0x673   :  { %5221 = vmatpush3.bf16.msra.mxu0 %v5778_v13  ;;  %v2943_v15 = vpop.f32.mrb[98].mxu1 }
 0x674   :  { %v2976_v16 = vpack.c.bf16 %v2943_v15, %v2940_v7  ;;  %v5165_v3 = vpop.f32.mrb[99].mxu1  ;;  %5222 = vmatprep.subr.bf16.mxu0 %v5678_v60 }
 0x676   :  { %5235 = vmatmul.mubr.msk.bf16.vlgmr.msra.gmra.mrb[116].mxu1 %vm1881_vm14, %v2976_v16 }
 0x677   :  { %5223 = vmatpush3.bf16.msra.mxu0 %v5783_v14  ;;  %5249 = vmatpush3.bf16.msra.mxu1 %v5818_v21 }
 0x678   :  { %5238 = vmatprep.subr.bf16.mxu0 %v5678_v60  ;;  %5250 = vmatprep.subr.bf16.mxu1 %v5678_v60 }
 0x679   :  { %v2948_v12 = vpop.f32.mrb[100].mxu1  ;;  %5254 = vmatprep.mubr.msk.bf16.mxu1 %vm5679_vm7, %v5678_v60 }
 0x67a   :  { %5225 = vmatmul.mubr.msk.bf16.vlgmr.msra.gmra.mrb[32].mxu0 %vm1881_vm14, %v2975_v59  ;;  %v5168_v13 = vpop.f32.mrb[101].mxu1 }
 0x67b   :  { %5239 = vmatpush3.bf16.msra.mxu0 %v5803_v18  ;;  %v2951_v17 = vpop.f32.mrb[102].mxu1  ;;  %5251 = vmatpush3.bf16.msra.mxu1 %v5823_v22 }
 0x67c   :  { %v2977_v4 = vpack.c.bf16 %v2951_v17, %v2948_v12  ;;  %v5169_v14 = vpop.f32.mrb[103].mxu1  ;;  %5240 = vmatprep.subr.bf16.mxu0 %v5678_v60  ;;  %5252 = vmatprep.subr.bf16.mxu1 %v5678_v60 }
 0x67d   :  { %5244 = vmatprep.mubr.msk.bf16.mxu0 %vm5679_vm7, %v5678_v60 }
 0x67f   :  { %5241 = vmatpush3.bf16.msra.mxu0 %v5808_v19  ;;  %5253 = vmatpush3.bf16.msra.mxu1 %v5828_v23 }
 0x680   :  { %5242 = vmatprep.subr.bf16.mxu0 %v5678_v60  ;;  %5268 = vmatprep.subr.bf16.mxu1 %v5678_v60 }
 0x681   :  { %v2956_v18 = vpop.f32.mrb[104].mxu1 }
 0x682   :  { %v5172_v21 = vpop.f32.mrb[105].mxu1 }
 0x683   :  { %5243 = vmatpush3.bf16.msra.mxu0 %v5813_v20  ;;  %v2959_v22 = vpop.f32.mrb[106].mxu1  ;;  %v4543_v21 = vld [vmem:[%s6979_s3 + $0x3] ss:$0 sm:$0xff] }
 0x684   :  { %v2978_v5 = vpack.c.bf16 %v2959_v22, %v2956_v18  ;;  %v5173_v9 = vpop.f32.mrb[107].mxu1  ;;  %5258 = vmatprep.subr.bf16.mxu0 %v5678_v60 }
 0x686   :  { %5245 = vmatmul.mubr.msk.bf16.vlgmr.msra.gmra.mrb[36].mxu0 %vm1881_vm14, %v2977_v4  ;;  %5255 = vmatmul.mubr.msk.bf16.vlgmr.msra.gmra.mrb[120].mxu1 %vm1881_vm14, %v2978_v5 }
 0x687   :  { %5259 = vmatpush3.bf16.msra.mxu0 %v5833_v24  ;;  %5264 = vmatprep.mubr.msk.bf16.mxu0 %vm5679_vm7, %v5678_v60 }
 0x688   :  { %5260 = vmatprep.subr.bf16.mxu0 %v5678_v60  ;;  %5270 = vmatprep.mubr.msk.bf16.mxu1 %vm5679_vm7, %v5678_v60 }
 0x689   :  { %v2964_v19 = vpop.f32.mrb[108].mxu1 }
 0x68a   :  { %v5176_v20 = vpop.f32.mrb[109].mxu1 }
 0x68b   :  { %5261 = vmatpush3.bf16.msra.mxu0 %v5838_v25  ;;  %v2967_v23 = vpop.f32.mrb[110].mxu1 }
 0x68c   :  { %v2979_v10 = vpack.c.bf16 %v2967_v23, %v2964_v19  ;;  %v5177_v11 = vpop.f32.mrb[111].mxu1  ;;  %5262 = vmatprep.subr.bf16.mxu0 %v5678_v60 }
 0x68f   :  { %5263 = vmatpush3.bf16.msra.mxu0 %v5843_v26 }
 0x690   :  { %5306 = vmatprep.subr.bf16.mxu0 %v5678_v60 }
 0x692   :  { %5265 = vmatmul.mubr.msk.bf16.vlgmr.msra.gmra.mrb[40].mxu0 %vm1881_vm14, %v2979_v10 }
 0x693   :  { %5307 = vmatpush3.bf16.msra.mxu0 %v5878_v33  ;;  %5318 = vmatprep.mubr.msk.bf16.mxu0 %vm5679_vm7, %v5678_v60 }
 0x694   :  { %5308 = vmatprep.subr.bf16.mxu0 %v5678_v60 }
 0x697   :  { %5309 = vmatpush3.bf16.msra.mxu0 %v5883_v34 }
 0x698   :  { %5310 = vmatprep.subr.bf16.mxu0 %v5678_v60 }
 0x69b   :  { %5311 = vmatpush3.bf16.msra.mxu0 %v5888_v35 }
 0x69c   :  { %5312 = vmatprep.subr.bf16.mxu0 %v5678_v60 }
 0x69f   :  { %5313 = vmatpush3.bf16.msra.mxu0 %v5893_v36 }
 0x6a0   :  { %5314 = vmatprep.subr.bf16.mxu0 %v5678_v60 }
 0x6a3   :  { %5315 = vmatpush3.bf16.msra.mxu0 %v5898_v37 }
 0x6a4   :  { %5316 = vmatprep.subr.bf16.mxu0 %v5678_v60 }
 0x6a7   :  { %5317 = vmatpush3.bf16.msra.mxu0 %v5903_v38 }
 0x6a8   :  { %5322 = vmatprep.subr.bf16.mxu0 %v5678_v60 }
 0x729   :  { %v3023_v24 = vpop.f32.mrb[20].mxu0 }
 0x72a   :  { %v5186_v25 = vpop.f32.mrb[21].mxu0 }
 0x72b   :  { %v3026_v26 = vpop.f32.mrb[22].mxu0 }
 0x72c   :  { %v5187_v33 = vpop.f32.mrb[23].mxu0 }
 0x735   :  { %v3067_v34 = vpop.f32.mrb[24].mxu0 }
 0x736   :  { %v3068_v35 = vadd.f32 %v3067_v34, %v3023_v24  ;;  %v5196_v56 = vpop.f32.mrb[25].mxu0  ;;  %v5666_v34 = vld [vmem:[%s6978_s2 + $0x178] sm:$0xff]  }
 0x737   :  { %v3070_v53 = vpop.f32.mrb[26].mxu0  ;;  %v5672_v56 = vld [vmem:[%s6978_s2 + $0x1a8] sm:$0xff]  }
 0x738   :  { %v3071_v42 = vadd.f32 %v3070_v53, %v3026_v26  ;;  %v5197_v36 = vpop.f32.mrb[27].mxu0  ;;  %v5673_v53 = vld [vmem:[%s6978_s2 + $0x1b0] sm:$0xff]  }
 0x739   :  { %v3163_v29 = vpop.f32.mrb[112].mxu1 }
 0x73a   :  { %v5216_v57 = vpop.f32.mrb[113].mxu1 }
 0x73b   :  { %v3166_v41 = vpop.f32.mrb[114].mxu1 }
 0x73c   :  { %v5217_v37 = vpop.f32.mrb[115].mxu1 }
 0x741   :  { %v3114_v61 = vpop.f32.mrb[28].mxu0 }
 0x742   :  { %v3121_v32 = vadd.f32 %v3114_v61, %v3068_v35  ;;  %v5206_v40 = vpop.f32.mrb[29].mxu0  ;;  %v5667_v35 = vld [vmem:[%s6978_s2 + $0x180] sm:$0xff]  }
 0x743   :  { %v3117_v38 = vpop.f32.mrb[30].mxu0 }
 0x744   :  { %v3122_v39 = vadd.f32 %v3117_v38, %v3071_v42  ;;  %v5207_v63 = vpop.f32.mrb[31].mxu0  ;;  %v3170_v30 = vadd.f32 %v3163_v29, %v3121_v32  ;;  %v5674_v42 = vld [vmem:[%s6978_s2 + $0x1b8] sm:$0xff]  }
 0x745   :  { %v7035_v63 = vld [vmem:[#allocation6_spill] sm:$0xff] }
 0x746   :  { %v3171_v58 = vadd.f32 %v3166_v41, %v3122_v39 }
 0x749   :  { %v3261_v52 = vpop.f32.mrb[116].mxu1 }
 0x74a   :  { %v5236_v54 = vpop.f32.mrb[117].mxu1 }
 0x74b   :  { %v3264_v43 = vpop.f32.mrb[118].mxu1 }
 0x74c   :  { %v5237_v28 = vpop.f32.mrb[119].mxu1 }
 0x74d   :  { %v3212_v51 = vpop.f32.mrb[32].mxu0 }
 0x74e   :  { %v3219_v0 = vadd.f32 %v3212_v51, %v3170_v30  ;;  %v5226_v44 = vpop.f32.mrb[33].mxu0  ;;  %v7037_v51 = vld [vmem:[#allocation8_spill] sm:$0xff] }
 0x74f   :  { %v3215_v1 = vpop.f32.mrb[34].mxu0 }
 0x750   :  { %v3220_v62 = vadd.f32 %v3215_v1, %v3171_v58  ;;  %v5227_v2 = vpop.f32.mrb[35].mxu0  ;;  %v3268_v6 = vadd.f32 %v3261_v52, %v3219_v0  ;;  %v7036_v52 = vld [vmem:[#allocation7_spill] sm:$0xff]  ;;  %v7038_v1 = vld [vmem:[#allocation9_spill] sm:$0xff] }
 0x752   :  { %v3269_v31 = vadd.f32 %v3264_v43, %v3220_v62 }
 0x759   :  { %v3310_v59 = vpop.f32.mrb[36].mxu0  ;;  %v3359_v27 = vpop.f32.mrb[120].mxu1 }
 0x75a   :  { %v3317_v7 = vadd.f32 %v3310_v59, %v3268_v6  ;;  %v5246_v8 = vpop.f32.mrb[37].mxu0  ;;  %v5256_v15 = vpop.f32.mrb[121].mxu1  ;;  %v7040_v59 = vld [vmem:[#allocation25_spill] sm:$0xff] }
 0x75b   :  { %v3313_v16 = vpop.f32.mrb[38].mxu0  ;;  %v3362_v3 = vpop.f32.mrb[122].mxu1  ;;  %v7041_v8 = vld [vmem:[#allocation11_spill] sm:$0xff]  ;;  %v7042_v15 = vld [vmem:[#allocation26_spill] sm:$0xff] }
 0x75c   :  { %v3366_v12 = vadd.f32 %v3359_v27, %v3317_v7  ;;  %v3318_v13 = vadd.f32 %v3313_v16, %v3269_v31  ;;  %v5247_v17 = vpop.f32.mrb[39].mxu0  ;;  %v5257_v4 = vpop.f32.mrb[123].mxu1  ;;  %v7039_v31 = vld [vmem:[#allocation10_spill] sm:$0xff] }
 0x75d   :  { %v7044_v17 = vld [vmem:[#allocation27_spill] sm:$0xff] }
 0x75e   :  { %v3367_v14 = vadd.f32 %v3362_v3, %v3318_v13  ;;  %v7043_v13 = vld [vmem:[#allocation12_spill] sm:$0xff] }
 0x765   :  { %v3408_v18 = vpop.f32.mrb[40].mxu0 }
 0x766   :  { %v3415_v22 = vadd.f32 %v3408_v18, %v3366_v12  ;;  %v5266_v5 = vpop.f32.mrb[41].mxu0  ;;  %v7045_v18 = vld [vmem:[#allocation13_spill] sm:$0xff] }
 0x767   :  { %v3411_v9 = vpop.f32.mrb[42].mxu0 }
 0x768   :  { %v3422_v19 = vadd.f32 %v4543_v21, %v3415_v22  ;;  %v3416_v20 = vadd.f32 %v3411_v9, %v3367_v14  ;;  %v5267_v23 = vpop.f32.mrb[43].mxu0 }
 0x76a   :  { %v3426_v10 = vmul.f32 0.01, %v3422_v19  ;;  %v3423_v11 = vadd.f32 %v4543_v21, %v3416_v20  ;;  %vm3424_vm8 = vcmp.ge.f32.partialorder %v3422_v19, 0.0  ;;  %v7046_v21 = vld [vmem:[#allocation28_spill] sm:$0xff]  ;;  %v7048_v20 = vld [vmem:[#allocation29_spill] sm:$0xff] }
 0x76c   :  { %vm3425_vm10 = vcmp.ge.f32.partialorder %v3423_v11, 0.0  ;;  %v3427_v24 = vmul.f32 0.01, %v3423_v11  ;;  %v3428_v25 = vsel %vm3424_vm8, %v3422_v19, %v3426_v10  ;;  %v7047_v19 = vld [vmem:[#allocation14_spill] sm:$0xff] }
 0x76e   :  { %v3429_v26 = vsel %vm3425_vm10, %v3423_v11, %v3427_v24  ;;  %v7049_v11 = vld [vmem:[#allocation15_spill] sm:$0xff]  ;;  %v7050_v24 = vld [vmem:[#allocation30_spill] sm:$0xff] }
 0x76f   :  { %v3430_v33 = vpack.c.bf16 %v3429_v26, %v3428_v25 }
 0x771   :  { %5269 = vmatpush3.bf16.msra.mxu1 %v3430_v33 }
 0x772   :  { %5354 = vmatprep.subr.bf16.mxu1 %v5678_v60 }
 0x774   :  { %5271 = vmatmul.mubr.msk.bf16.vlgmr.msra.gmra.mrb[124].mxu1 %vm3494_vm11, %v5666_v34  ;;  %v7051_v34 = vld [vmem:[#allocation16_spill] sm:$0xff] }
 0x775   :  { %5274 = vmatprep.mubr.msk.bf16.mxu1 %vm5679_vm7, %v5678_v60  ;;  %5355 = vmatpush3.bf16.msra.mxu1 %v5938_v45  ;;  %v5668_v45 = vld [vmem:[%s6978_s2 + $0x188] sm:$0xff]  }
 0x776   :  { %5356 = vmatprep.subr.bf16.mxu1 %v5678_v60 }
 0x779   :  { %5357 = vmatpush3.bf16.msra.mxu1 %v5943_v46  ;;  %v5669_v46 = vld [vmem:[%s6978_s2 + $0x190] sm:$0xff]  }
 0x77a   :  { %5358 = vmatprep.subr.bf16.mxu1 %v5678_v60 }
 0x77c   :  { %5275 = vmatmul.mubr.msk.bf16.gmra.mrb[128].mxu1 %vm3494_vm11, %v5667_v35  ;;  %v7052_v35 = vld [vmem:[#allocation37_spill] sm:$0xff] }
 0x77d   :  { %5278 = vmatprep.mubr.msk.bf16.mxu1 %vm5679_vm7, %v5678_v60  ;;  %5359 = vmatpush3.bf16.msra.mxu1 %v5948_v47  ;;  %v7034_v47 = vld [vmem:[#allocation18_spill] sm:$0xff] }
 0x77e   :  { %5360 = vmatprep.subr.bf16.mxu1 %v5678_v60 }
 0x781   :  { %5361 = vmatpush3.bf16.msra.mxu1 %v5953_v48  ;;  %v5670_v48 = vld [vmem:[%s6978_s2 + $0x198] sm:$0xff]  }
 0x782   :  { %5362 = vmatprep.subr.bf16.mxu1 %v5678_v60 }
 0x784   :  { %5279 = vmatmul.mubr.msk.bf16.gmra.mrb[132].mxu1 %vm3494_vm11, %v5668_v45 }
 0x785   :  { %5282 = vmatprep.mubr.msk.bf16.mxu1 %vm5679_vm7, %v5678_v60  ;;  %5363 = vmatpush3.bf16.msra.mxu1 %v5958_v49  ;;  %v5671_v49 = vld [vmem:[%s6978_s2 + $0x1a0] sm:$0xff]  }
 0x786   :  { %5364 = vmatprep.subr.bf16.mxu1 %v5678_v60 }
 0x789   :  { %5365 = vmatpush3.bf16.msra.mxu1 %v7034_v47  ;;  %v7053_v47 = vld [vmem:[#allocation17_spill] sm:$0xff] }
 0x78a   :  { %5386 = vmatprep.subr.bf16.mxu1 %v5678_v60 }
 0x78c   :  { %5283 = vmatmul.mubr.msk.bf16.gmra.mrb[136].mxu1 %vm3494_vm11, %v5669_v46 }
 0x78d   :  { %5286 = vmatprep.mubr.msk.bf16.mxu1 %vm5679_vm7, %v5678_v60 }
 0x794   :  { %5287 = vmatmul.mubr.msk.bf16.gmra.mrb[140].mxu1 %vm3494_vm11, %v5670_v48  ;;  %v7054_v48 = vld [vmem:[#allocation38_spill] sm:$0xff] }
 0x795   :  { %5290 = vmatprep.mubr.msk.bf16.mxu1 %vm5679_vm7, %v5678_v60 }
 0x79c   :  { %5291 = vmatmul.mubr.msk.bf16.gmra.mrb[144].mxu1 %vm3494_vm11, %v5671_v49 }
 0x79d   :  { %5294 = vmatprep.mubr.msk.bf16.mxu1 %vm5679_vm7, %v5678_v60 }
 0x7a4   :  { %5295 = vmatmul.mubr.msk.bf16.gmra.mrb[148].mxu1 %vm3494_vm11, %v5672_v56 }
 0x7a5   :  { %5298 = vmatprep.mubr.msk.bf16.mxu1 %vm5679_vm7, %v5678_v60 }
 0x7ac   :  { %5299 = vmatmul.mubr.msk.bf16.gmra.mrb[152].mxu1 %vm3494_vm11, %v5673_v53 }
 0x7ad   :  { %5302 = vmatprep.mubr.msk.bf16.mxu1 %vm5679_vm7, %v5678_v60 }
 0x7b4   :  { %5303 = vmatmul.mubr.msk.bf16.gmra.mrb[156].mxu1 %vm3494_vm11, %v5674_v42  ;;  %v7055_v42 = vld [vmem:[#allocation19_spill] sm:$0xff] }
 0x7b5   :  { %5366 = vmatprep.mubr.msk.bf16.mxu1 %vm5679_vm7, %v5678_v60 }
 0x847   :  { %v3556_v36 = vpop.f32.mrb[124].mxu1 }
 0x848   :  { %v5272_v29 = vpop.f32.mrb[125].mxu1 }
 0x849   :  { %v3559_v57 = vpop.f32.mrb[126].mxu1 }
 0x84a   :  { %v3627_v41 = vpack.c.bf16 %v3559_v57, %v3556_v36  ;;  %v5273_v37 = vpop.f32.mrb[127].mxu1  ;;  %v7056_v36 = vld [vmem:[#allocation39_spill] sm:$0xff] }
 0x84b   :  { %v7058_v37 = vld [vmem:[#allocation40_spill] sm:$0xff] }
 0x84f   :  { %v3564_v61 = vpop.f32.mrb[128].mxu1 }
 0x850   :  { %v5276_v32 = vpop.f32.mrb[129].mxu1 }
 0x851   :  { %v3567_v40 = vpop.f32.mrb[130].mxu1 }
 0x852   :  { %v3628_v38 = vpack.c.bf16 %v3567_v40, %v3564_v61  ;;  %v5277_v39 = vpop.f32.mrb[131].mxu1 }
 0x853   :  { %v7060_v39 = vld [vmem:[#allocation41_spill] sm:$0xff] }
 0x854   :  { %5319 = vmatmul.mubr.msk.bf16.vlgmr.msra.gmra.mrb[44].mxu0 %vm3648_vm12, %v3628_v38  ;;  %v7059_v38 = vld [vmem:[#allocation21_spill] sm:$0xff] }
 0x855   :  { %5323 = vmatpush3.bf16.msra.mxu0 %v7035_v63  ;;  %5334 = vmatprep.mubr.msk.bf16.mxu0 %vm5679_vm7, %v5678_v60  ;;  %v7061_v63 = vld [vmem:[#allocation22_spill] sm:$0xff] }
 0x856   :  { %5324 = vmatprep.subr.bf16.mxu0 %v5678_v60 }
 0x857   :  { %v6796_v30 = vpop.f32.mrb[132].mxu1 }
 0x858   :  { %v5280_v58 = vpop.f32.mrb[133].mxu1 }
 0x859   :  { %5325 = vmatpush3.bf16.msra.mxu0 %v7036_v52  ;;  %v6799_v54 = vpop.f32.mrb[134].mxu1  ;;  %v7063_v58 = vld [vmem:[#allocation23_spill] sm:$0xff]  ;;  %v5675_v52 = vld [vmem:[%s6978_s2 + $0x1c0] sm:$0xff]  }
 0x85a   :  { %v3629_v43 = vpack.c.bf16 %v6799_v54, %v6796_v30  ;;  %v5281_v28 = vpop.f32.mrb[135].mxu1  ;;  %5326 = vmatprep.subr.bf16.mxu0 %v5678_v60  ;;  %v7062_v30 = vld [vmem:[#allocation42_spill] sm:$0xff]  ;;  %v7064_v54 = vld [vmem:[#allocation24_spill] sm:$0xff] }
 0x85b   :  { %v7068_v28 = vld [vmem:[#allocation50_spill] sm:$0xff] }
 0x85d   :  { %5327 = vmatpush3.bf16.msra.mxu0 %v7037_v51  ;;  %v7069_v51 = vld [vmem:[#allocation33_spill] sm:$0xff] }
 0x85e   :  { %5328 = vmatprep.subr.bf16.mxu0 %v5678_v60 }
 0x85f   :  { %v3580_v0 = vpop.f32.mrb[136].mxu1 }
 0x860   :  { %v5284_v44 = vpop.f32.mrb[137].mxu1 }
 0x861   :  { %5329 = vmatpush3.bf16.msra.mxu0 %v7038_v1  ;;  %v3583_v62 = vpop.f32.mrb[138].mxu1  ;;  %v7071_v44 = vld [vmem:[#allocation34_spill] sm:$0xff]  ;;  %v7072_v1 = vld [vmem:[#allocation35_spill] sm:$0xff] }
 0x862   :  { %v3630_v2 = vpack.c.bf16 %v3583_v62, %v3580_v0  ;;  %v5285_v6 = vpop.f32.mrb[139].mxu1  ;;  %5330 = vmatprep.subr.bf16.mxu0 %v5678_v60  ;;  %v7070_v0 = vld [vmem:[#allocation51_spill] sm:$0xff]  ;;  %v7073_v62 = vld [vmem:[#allocation36_spill] sm:$0xff] }
 0x863   :  { %v7075_v6 = vld [vmem:[#allocation44_spill] sm:$0xff] }
 0x864   :  { %5367 = vmatmul.mubr.msk.bf16.vlgmr.msra.gmra.mrb[160].mxu1 %vm3648_vm12, %v3630_v2  ;;  %v7074_v2 = vld [vmem:[#allocation43_spill] sm:$0xff] }
 0x865   :  { %5331 = vmatpush3.bf16.msra.mxu0 %v7039_v31  ;;  %5387 = vmatpush3.bf16.msra.mxu1 %v7040_v59  ;;  %v7076_v31 = vld [vmem:[#allocation45_spill] sm:$0xff]  ;;  %v7077_v59 = vld [vmem:[#allocation46_spill] sm:$0xff] }
 0x866   :  { %5332 = vmatprep.subr.bf16.mxu0 %v5678_v60  ;;  %5388 = vmatprep.subr.bf16.mxu1 %v5678_v60 }
 0x867   :  { %v6813_v27 = vpop.f32.mrb[140].mxu1  ;;  %5398 = vmatprep.mubr.msk.bf16.mxu1 %vm5679_vm7, %v5678_v60 }
 0x868   :  { %v5288_v7 = vpop.f32.mrb[141].mxu1 }
 0x869   :  { %5333 = vmatpush3.bf16.msra.mxu0 %v7041_v8  ;;  %5389 = vmatpush3.bf16.msra.mxu1 %v7042_v15  ;;  %v6819_v16 = vpop.f32.mrb[142].mxu1  ;;  %v7079_v7 = vld [vmem:[#allocation48_spill] sm:$0xff] }
 0x86a   :  { %5338 = vmatprep.subr.bf16.mxu0 %v5678_v60  ;;  %5390 = vmatprep.subr.bf16.mxu1 %v5678_v60  ;;  %v3631_v3 = vpack.c.bf16 %v6819_v16, %v6813_v27  ;;  %v5289_v12 = vpop.f32.mrb[143].mxu1  ;;  %v7078_v27 = vld [vmem:[#allocation47_spill] sm:$0xff] }
 0x86c   :  { %5335 = vmatmul.mubr.msk.bf16.vlgmr.msra.gmra.mrb[48].mxu0 %vm3648_vm12, %v3627_v41  ;;  %v7057_v41 = vld [vmem:[#allocation20_spill] sm:$0xff] }
 0x86d   :  { %5339 = vmatpush3.bf16.msra.mxu0 %v7043_v13  ;;  %5391 = vmatpush3.bf16.msra.mxu1 %v7044_v17 }
 0x86e   :  { %5340 = vmatprep.subr.bf16.mxu0 %v5678_v60  ;;  %5392 = vmatprep.subr.bf16.mxu1 %v5678_v60 }
 0x86f   :  { %v3596_v4 = vpop.f32.mrb[144].mxu1  ;;  %5350 = vmatprep.mubr.msk.bf16.mxu0 %vm5679_vm7, %v5678_v60 }
 0x870   :  { %v5292_v14 = vpop.f32.mrb[145].mxu1 }
 0x871   :  { %5341 = vmatpush3.bf16.msra.mxu0 %v7045_v18  ;;  %5393 = vmatpush3.bf16.msra.mxu1 %v7046_v21  ;;  %v3599_v22 = vpop.f32.mrb[146].mxu1 }
 0x872   :  { %5342 = vmatprep.subr.bf16.mxu0 %v5678_v60  ;;  %5394 = vmatprep.subr.bf16.mxu1 %v5678_v60  ;;  %v3632_v5 = vpack.c.bf16 %v3599_v22, %v3596_v4  ;;  %v5293_v9 = vpop.f32.mrb[147].mxu1 }
 0x875   :  { %5343 = vmatpush3.bf16.msra.mxu0 %v7047_v19  ;;  %5395 = vmatpush3.bf16.msra.mxu1 %v7048_v20 }
 0x876   :  { %5344 = vmatprep.subr.bf16.mxu0 %v5678_v60  ;;  %5396 = vmatprep.subr.bf16.mxu1 %v5678_v60 }
 0x877   :  { %v6840_v23 = vpop.f32.mrb[148].mxu1 }
 0x878   :  { %v5296_v10 = vpop.f32.mrb[149].mxu1 }
 0x879   :  { %5345 = vmatpush3.bf16.msra.mxu0 %v7049_v11  ;;  %5397 = vmatpush3.bf16.msra.mxu1 %v7050_v24  ;;  %v6844_v25 = vpop.f32.mrb[150].mxu1 }
 0x87a   :  { %5346 = vmatprep.subr.bf16.mxu0 %v5678_v60  ;;  %5418 = vmatprep.subr.bf16.mxu1 %v5678_v60  ;;  %v3633_v26 = vpack.c.bf16 %v6844_v25, %v6840_v23  ;;  %v5297_v33 = vpop.f32.mrb[151].mxu1 }
 0x87c   :  { %5399 = vmatmul.mubr.msk.bf16.vlgmr.msra.gmra.mrb[164].mxu1 %vm3648_vm12, %v3632_v5 }
 0x87d   :  { %5347 = vmatpush3.bf16.msra.mxu0 %v7051_v34  ;;  %5419 = vmatpush3.bf16.msra.mxu1 %v7052_v35 }
 0x87e   :  { %5348 = vmatprep.subr.bf16.mxu0 %v5678_v60  ;;  %5420 = vmatprep.subr.bf16.mxu1 %v5678_v60 }
 0x87f   :  { %v3612_v45 = vpop.f32.mrb[152].mxu1  ;;  %5430 = vmatprep.mubr.msk.bf16.mxu1 %vm5679_vm7, %v5678_v60 }
 0x880   :  { %v5300_v46 = vpop.f32.mrb[153].mxu1 }
 0x881   :  { %5349 = vmatpush3.bf16.msra.mxu0 %v7053_v47  ;;  %5421 = vmatpush3.bf16.msra.mxu1 %v7054_v48  ;;  %v3615_v49 = vpop.f32.mrb[154].mxu1 }
 0x882   :  { %5370 = vmatprep.subr.bf16.mxu0 %v5678_v60  ;;  %5422 = vmatprep.subr.bf16.mxu1 %v5678_v60  ;;  %v3634_v56 = vpack.c.bf16 %v3615_v49, %v3612_v45  ;;  %v5301_v53 = vpop.f32.mrb[155].mxu1 }
 0x884   :  { %5351 = vmatmul.mubr.msk.bf16.vlgmr.msra.gmra.mrb[52].mxu0 %vm3648_vm12, %v3629_v43  ;;  %v7066_v43 = vld [vmem:[#allocation49_spill] sm:$0xff] }
 0x885   :  { %5371 = vmatpush3.bf16.msra.mxu0 %v7055_v42  ;;  %5423 = vmatpush3.bf16.msra.mxu1 %v7056_v36 }
 0x886   :  { %5372 = vmatprep.subr.bf16.mxu0 %v5678_v60  ;;  %5424 = vmatprep.subr.bf16.mxu1 %v5678_v60 }
 0x887   :  { %5382 = vmatprep.mubr.msk.bf16.mxu0 %vm5679_vm7, %v5678_v60  ;;  %v6871_v29 = vpop.f32.mrb[156].mxu1 }
 0x888   :  { %v5304_v57 = vpop.f32.mrb[157].mxu1 }
 0x889   :  { %5373 = vmatpush3.bf16.msra.mxu0 %v7057_v41  ;;  %5425 = vmatpush3.bf16.msra.mxu1 %v7058_v37  ;;  %v3623_v61 = vpop.f32.mrb[158].mxu1 }
 0x88a   :  { %5374 = vmatprep.subr.bf16.mxu0 %v5678_v60  ;;  %5426 = vmatprep.subr.bf16.mxu1 %v5678_v60  ;;  %v3635_v32 = vpack.c.bf16 %v3623_v61, %v6871_v29  ;;  %v5305_v40 = vpop.f32.mrb[159].mxu1 }
 0x88d   :  { %5375 = vmatpush3.bf16.msra.mxu0 %v7059_v38  ;;  %5427 = vmatpush3.bf16.msra.mxu1 %v7060_v39 }
 0x88e   :  { %5376 = vmatprep.subr.bf16.mxu0 %v5678_v60  ;;  %5428 = vmatprep.subr.bf16.mxu1 %v5678_v60 }
 0x891   :  { %5377 = vmatpush3.bf16.msra.mxu0 %v7061_v63  ;;  %5429 = vmatpush3.bf16.msra.mxu1 %v7062_v30  ;;  %v7080_v63 = vld [vmem:[#allocation52_spill] sm:$0xff]  ;;  %v7081_v30 = vld [vmem:[#allocation53_spill] sm:$0xff] }
 0x892   :  { %5378 = vmatprep.subr.bf16.mxu0 %v5678_v60  ;;  %5450 = vmatprep.subr.bf16.mxu1 %v5678_v60 }
 0x894   :  { %5431 = vmatmul.mubr.msk.bf16.vlgmr.msra.gmra.mrb[168].mxu1 %vm3648_vm12, %v3634_v56 }
 0x895   :  { %5379 = vmatpush3.bf16.msra.mxu0 %v7063_v58  ;;  %5451 = vmatpush3.bf16.msra.mxu1 %v6562_v55  ;;  %v7065_v55 = vld [vmem:[#allocation31_spill] sm:$0xff]  ;;  %v7082_v58 = vld [vmem:[#allocation54_spill] sm:$0xff] }
 0x896   :  { %5380 = vmatprep.subr.bf16.mxu0 %v5678_v60  ;;  %5452 = vmatprep.subr.bf16.mxu1 %v5678_v60 }
 0x897   :  { %5454 = vmatprep.mubr.msk.bf16.mxu1 %vm5679_vm7, %v5678_v60 }
 0x899   :  { %5381 = vmatpush3.bf16.msra.mxu0 %v7064_v54  ;;  %5453 = vmatpush3.bf16.msra.mxu1 %v6560_v50  ;;  %v7067_v50 = vld [vmem:[#allocation32_spill] sm:$0xff] }
 0x89a   :  { %5402 = vmatprep.subr.bf16.mxu0 %v5678_v60  ;;  %5458 = vmatprep.subr.bf16.mxu1 %v5678_v60  ;;  %v7084_v54 = vld [vmem:[#allocation56_spill] sm:$0xff] }
 0x89c   :  { %5383 = vmatmul.mubr.msk.bf16.vlgmr.msra.gmra.mrb[56].mxu0 %vm3648_vm12, %v3631_v3  ;;  %5455 = vmatmul.mubr.msk.bf16.vlgmr.msra.gmra.mrb[172].mxu1 %vm805_vm9, %v5675_v52  ;;  %v7083_v52 = vld [vmem:[#allocation55_spill] sm:$0xff] }
 0x89d   :  { %5403 = vmatpush3.bf16.msra.mxu0 %v7065_v55  ;;  %5414 = vmatprep.mubr.msk.bf16.mxu0 %vm5679_vm7, %v5678_v60 }
 0x89e   :  { %5404 = vmatprep.subr.bf16.mxu0 %v5678_v60  ;;  %5459 = vmatpush3.bf16.msra.mxu1 %v7066_v43 }
 0x89f   :  { %5460 = vmatprep.subr.bf16.mxu1 %v5678_v60  ;;  %5464 = vmatprep.mubr.msk.bf16.mxu1 %vm5679_vm7, %v5678_v60 }
 0x8a1   :  { %5405 = vmatpush3.bf16.msra.mxu0 %v7067_v50 }
 0x8a2   :  { %5406 = vmatprep.subr.bf16.mxu0 %v5678_v60  ;;  %5461 = vmatpush3.bf16.msra.mxu1 %v7068_v28 }
 0x8a3   :  { %5462 = vmatprep.subr.bf16.mxu1 %v5678_v60 }
 0x8a5   :  { %5407 = vmatpush3.bf16.msra.mxu0 %v7069_v51  ;;  %v7085_v51 = vld [vmem:[#allocation57_spill] sm:$0xff] }
 0x8a6   :  { %5408 = vmatprep.subr.bf16.mxu0 %v5678_v60  ;;  %5463 = vmatpush3.bf16.msra.mxu1 %v7070_v0 }
 0x8a7   :  { %5474 = vmatprep.subr.bf16.mxu1 %v5678_v60 }
 0x8a9   :  { %5409 = vmatpush3.bf16.msra.mxu0 %v7071_v44 }
 0x8aa   :  { %5410 = vmatprep.subr.bf16.mxu0 %v5678_v60 }
 0x8ad   :  { %5411 = vmatpush3.bf16.msra.mxu0 %v7072_v1 }
 0x8ae   :  { %5412 = vmatprep.subr.bf16.mxu0 %v5678_v60 }
 0x8b1   :  { %5413 = vmatpush3.bf16.msra.mxu0 %v7073_v62 }
 0x8b2   :  { %5434 = vmatprep.subr.bf16.mxu0 %v5678_v60 }
 0x8b4   :  { %5415 = vmatmul.mubr.msk.bf16.vlgmr.msra.gmra.mrb[60].mxu0 %vm3648_vm12, %v3633_v26 }
 0x8b5   :  { %5435 = vmatpush3.bf16.msra.mxu0 %v7074_v2  ;;  %5446 = vmatprep.mubr.msk.bf16.mxu0 %vm5679_vm7, %v5678_v60 }
 0x8b6   :  { %5436 = vmatprep.subr.bf16.mxu0 %v5678_v60 }
 0x8b9   :  { %5437 = vmatpush3.bf16.msra.mxu0 %v7075_v6 }
 0x8ba   :  { %5438 = vmatprep.subr.bf16.mxu0 %v5678_v60 }
 0x8bd   :  { %5439 = vmatpush3.bf16.msra.mxu0 %v7076_v31 }
 0x8be   :  { %5440 = vmatprep.subr.bf16.mxu0 %v5678_v60 }
 0x8c1   :  { %5441 = vmatpush3.bf16.msra.mxu0 %v7077_v59 }
 0x8c2   :  { %5442 = vmatprep.subr.bf16.mxu0 %v5678_v60 }
 0x8c5   :  { %5443 = vmatpush3.bf16.msra.mxu0 %v7078_v27 }
 0x8c6   :  { %5444 = vmatprep.subr.bf16.mxu0 %v5678_v60 }
 0x8c9   :  { %5445 = vmatpush3.bf16.msra.mxu0 %v7079_v7 }
 0x8ca   :  { %5468 = vmatprep.subr.bf16.mxu0 %v5678_v60 }
 0x8cc   :  { %5447 = vmatmul.mubr.msk.bf16.vlgmr.msra.gmra.mrb[64].mxu0 %vm3648_vm12, %v3635_v32 }
 0x8cd   :  { %5470 = vmatprep.mubr.msk.bf16.mxu0 %vm5679_vm7, %v5678_v60 }
 0x927   :  { %v3686_v8 = vpop.f32.mrb[44].mxu0 }
 0x928   :  { %v5320_v15 = vpop.f32.mrb[45].mxu0 }
 0x929   :  { %v3689_v16 = vpop.f32.mrb[46].mxu0 }
 0x92a   :  { %v5321_v3 = vpop.f32.mrb[47].mxu0 }
 0x937   :  { %v3832_v12 = vpop.f32.mrb[160].mxu1 }
 0x938   :  { %v5368_v13 = vpop.f32.mrb[161].mxu1 }
 0x939   :  { %v3835_v17 = vpop.f32.mrb[162].mxu1 }
 0x93a   :  { %v5369_v4 = vpop.f32.mrb[163].mxu1 }
 0x93f   :  { %v3730_v14 = vpop.f32.mrb[48].mxu0 }
 0x940   :  { %v3731_v18 = vadd.f32 %v3730_v14, %v3686_v8  ;;  %v5336_v21 = vpop.f32.mrb[49].mxu0 }
 0x941   :  { %v3733_v22 = vpop.f32.mrb[50].mxu0 }
 0x942   :  { %v3734_v5 = vadd.f32 %v3733_v22, %v3689_v16  ;;  %v5337_v9 = vpop.f32.mrb[51].mxu0 }
 0x94f   :  { %v3936_v19 = vpop.f32.mrb[164].mxu1 }
 0x950   :  { %v5400_v20 = vpop.f32.mrb[165].mxu1 }
 0x951   :  { %v3939_v23 = vpop.f32.mrb[166].mxu1 }
 0x952   :  { %v5401_v10 = vpop.f32.mrb[167].mxu1 }
 0x953   :  { %v4222_v10 = vld [vmem:[%s6978_s2 + $0x1c8] sm:$0xf] }
 0x957   :  { %v3780_v11 = vpop.f32.mrb[52].mxu0 }
 0x958   :  { %v3787_v24 = vadd.f32 %v3780_v11, %v3731_v18  ;;  %v5352_v25 = vpop.f32.mrb[53].mxu0 }
 0x959   :  { %v3783_v26 = vpop.f32.mrb[54].mxu0 }
 0x95a   :  { %v3788_v33 = vadd.f32 %v3783_v26, %v3734_v5  ;;  %v5353_v34 = vpop.f32.mrb[55].mxu0  ;;  %v3839_v35 = vadd.f32 %v3832_v12, %v3787_v24 }
 0x95b   :  { %v4576_v34 = vld [vmem:[%s6979_s3 + $0x5] ss:$0 sm:$0xff] }
 0x95c   :  { %v3840_v45 = vadd.f32 %v3835_v17, %v3788_v33 }
 0x967   :  { %v4040_v46 = vpop.f32.mrb[168].mxu1 }
 0x968   :  { %v5432_v47 = vpop.f32.mrb[169].mxu1 }
 0x969   :  { %v4043_v48 = vpop.f32.mrb[170].mxu1 }
 0x96a   :  { %v5433_v49 = vpop.f32.mrb[171].mxu1 }
 0x96f   :  { %v3884_v56 = vpop.f32.mrb[56].mxu0  ;;  %v4158_v53 = vpop.f32.mrb[172].mxu1 }
 0x970   :  { %v3891_v42 = vadd.f32 %v3884_v56, %v3839_v35  ;;  %v5384_v36 = vpop.f32.mrb[57].mxu0  ;;  %v5456_v29 = vpop.f32.mrb[173].mxu1 }
 0x971   :  { %v3887_v57 = vpop.f32.mrb[58].mxu0  ;;  %v4161_v41 = vpop.f32.mrb[174].mxu1 }
 0x972   :  { %v3892_v37 = vadd.f32 %v3887_v57, %v3840_v45  ;;  %v4165_v61 = vpack.c.bf16 %v4161_v41, %v4158_v53  ;;  %v5385_v32 = vpop.f32.mrb[59].mxu0  ;;  %v5457_v40 = vpop.f32.mrb[175].mxu1  ;;  %v3943_v38 = vadd.f32 %v3936_v19, %v3891_v42 }
 0x974   :  { %5465 = vmatmul.mubr.msk.bf16.vlgmr.msra.gmra.mrb[176].mxu1 %vm1881_vm14, %v4165_v61  ;;  %v3944_v39 = vadd.f32 %v3939_v23, %v3892_v37 }
 0x975   :  { %5475 = vmatpush3.bf16.msra.mxu1 %v7080_v63  ;;  %5486 = vmatprep.mubr.msk.bf16.mxu1 %vm5679_vm7, %v5678_v60 }
 0x976   :  { %5476 = vmatprep.subr.bf16.mxu1 %v5678_v60 }
 0x979   :  { %5477 = vmatpush3.bf16.msra.mxu1 %v7081_v30 }
 0x97a   :  { %5478 = vmatprep.subr.bf16.mxu1 %v5678_v60 }
 0x97d   :  { %5479 = vmatpush3.bf16.msra.mxu1 %v7082_v58 }
 0x97e   :  { %5480 = vmatprep.subr.bf16.mxu1 %v5678_v60 }
 0x981   :  { %5481 = vmatpush3.bf16.msra.mxu1 %v7083_v52 }
 0x982   :  { %5482 = vmatprep.subr.bf16.mxu1 %v5678_v60 }
 0x985   :  { %5483 = vmatpush3.bf16.msra.mxu1 %v7084_v54 }
 0x986   :  { %5484 = vmatprep.subr.bf16.mxu1 %v5678_v60  ;;  %v4571_v60 = vld [vmem:[%s6979_s3 + $0x4] ss:$0 sm:$0xff] }
 0x987   :  { %v3988_v55 = vpop.f32.mrb[60].mxu0 }
 0x988   :  { %v3995_v43 = vadd.f32 %v3988_v55, %v3943_v38  ;;  %v5416_v50 = vpop.f32.mrb[61].mxu0 }
 0x989   :  { %v3991_v28 = vpop.f32.mrb[62].mxu0  ;;  %5485 = vmatpush3.bf16.msra.mxu1 %v7085_v51 }
 0x98a   :  { %v3996_v0 = vadd.f32 %v3991_v28, %v3944_v39  ;;  %v5417_v44 = vpop.f32.mrb[63].mxu0  ;;  %v4047_v1 = vadd.f32 %v4040_v46, %v3995_v43 }
 0x98c   :  { %v4048_v62 = vadd.f32 %v4043_v48, %v3996_v0 }
 0x99f   :  { %v4092_v2 = vpop.f32.mrb[64].mxu0 }
 0x9a0   :  { %v4099_v6 = vadd.f32 %v4092_v2, %v4047_v1  ;;  %v5448_v31 = vpop.f32.mrb[65].mxu0 }
 0x9a1   :  { %v4095_v59 = vpop.f32.mrb[66].mxu0 }
 0x9a2   :  { %v4100_v27 = vadd.f32 %v4095_v59, %v4048_v62  ;;  %v5449_v7 = vpop.f32.mrb[67].mxu0  ;;  %v4106_v8 = vadd.f32 %v4571_v60, %v4099_v6 }
 0x9a4   :  { %v4107_v15 = vadd.f32 %v4571_v60, %v4100_v27  ;;  %v4110_v16 = vmul.f32 0.01, %v4106_v8  ;;  %vm4108_vm9 = vcmp.ge.f32.partialorder %v4106_v8, 0.0 }
 0x9a6   :  { %v4111_v3 = vmul.f32 0.01, %v4107_v15  ;;  %vm4109_vm13 = vcmp.ge.f32.partialorder %v4107_v15, 0.0  ;;  %v4112_v12 = vsel %vm4108_vm9, %v4106_v8, %v4110_v16 }
 0x9a8   :  { %v4113_v14 = vsel %vm4109_vm13, %v4107_v15, %v4111_v3 }
 0xa47   :  { %v4206_v13 = vpop.f32.mrb[176].mxu1 }
 0xa48   :  { %v4213_v17 = vadd.f32 %v4206_v13, %v4112_v12  ;;  %v5466_v4 = vpop.f32.mrb[177].mxu1 }
 0xa49   :  { %v4209_v18 = vpop.f32.mrb[178].mxu1 }
 0xa4a   :  { %v4217_v21 = vmul.f32 0.01, %v4213_v17  ;;  %v4214_v22 = vadd.f32 %v4209_v18, %v4113_v14  ;;  %v5467_v5 = vpop.f32.mrb[179].mxu1  ;;  %vm4215_vm14 = vcmp.ge.f32.partialorder %v4213_v17, 0.0 }
 0xa4c   :  { %vm4216_vm15 = vcmp.ge.f32.partialorder %v4214_v22, 0.0  ;;  %v4218_v9 = vmul.f32 0.01, %v4214_v22  ;;  %v4219_v19 = vsel %vm4215_vm14, %v4213_v17, %v4217_v21 }
 0xa4e   :  { %v4220_v20 = vsel %vm4216_vm15, %v4214_v22, %v4218_v9 }
 0xa4f   :  { %v4221_v23 = vpack.c.bf16 %v4220_v20, %v4219_v19 }
 0xa51   :  { %5469 = vmatpush3.bf16.msra.mxu0 %v4221_v23 }
 0xa54   :  { %5471 = vmatmul.mubr.msk.bf16.vlgmr.msra.gmra.mrb[68].mxu0 %vm3494_vm11, %v4222_v10 }
 0xb27   :  { %v4260_v11 = vpop.f32.mrb[68].mxu0 }
 0xb28   :  { %v4266_v24 = vpack.c.bf16 %v4260_v11, %v4260_v11  ;;  %v5472_v25 = vpop.f32.mrb[69].mxu0 }
 0xb29   :  { %v4263_v26 = vpop.f32.mrb[70].mxu0 }
 0xb2a   :  { %v5473_v33 = vpop.f32.mrb[71].mxu0  ;;  %5487 = vmatmul.mubr.msk.bf16.vlgmr.msra.gmra.mrb[180].mxu1 %vm3648_vm12, %v4266_v24 }
 0xbfd   :  { %v4315_v35 = vpop.f32.mrb[180].mxu1 }
 0xbfe   :  { %v4316_v45 = vadd.f32 %v4576_v34, %v4315_v35  ;;  %v5488_v46 = vpop.f32.mrb[181].mxu1 }
 0xbff   :  { %v4318_v47 = vpop.f32.mrb[182].mxu1 }
 0xc00   :  { %4321 = vst [vmem:[%s6981_s5] sm:$0xff] %v4316_v45  ;;  %v5489_v48 = vpop.f32.mrb[183].mxu1 }
 0xc01   :  { %4326 = vsyncmov [#allocation3] }
 0xc04   :  { %s4327_s2 = vpop.sfrf %4326 }
 0xc05   :  { %p4578_p0 = scmp.ne.s32.totalorder %s4327_s2, 0 }
 0xc07   :  { %4331 = shalt.err (%p4578_p0)  }

</bundles_post_ra>
